<compile_context>
chip_gen: v6e
topology: v6e:2x2x1
jax: 0.10.0
libtpu: 0.0.40
codegen_flags: <defaults>
</compile_context>

<pallas_src>
import functools
import math

import jax
import jax.numpy as jnp
from jax.experimental import pallas as pl
from jax.experimental.pallas import tpu as pltpu

_VMEM_SPEC = pl.BlockSpec(memory_space=pltpu.MemorySpace.VMEM)
_VMEM_LIMIT = 64 * 1024 * 1024  # explicit scoped-VMEM cap (safe on v5e/v6e/v7x)


def _pick_tile(s, max_tile=512):
    """Largest spatial tile <= max_tile that divides s and is a multiple of 8."""
    if s % 8 != 0:
        return s
    for t in (512, 384, 256, 128, 64, 32, 16, 8):
        if t <= max_tile and t <= s and s % t == 0:
            return t
    return s


# --------------------------- Kernel 1: global average pool ---------------------------
def _pool_sum_kernel(x_ref, o_ref, acc_ref, *, inv_n):
    s_idx = pl.program_id(1)

    @pl.when(s_idx == 0)
    def _():
        acc_ref[...] = jnp.zeros_like(acc_ref)

    # x_ref: (1, TILE_S, C) -> partial sum (1, 1, C)
    acc_ref[...] += jnp.sum(x_ref[...], axis=1, keepdims=True)

    @pl.when(s_idx == pl.num_programs(1) - 1)
    def _():
        o_ref[...] = (acc_ref[...] * inv_n).astype(o_ref.dtype)


def global_avg_pool(x_nhwc):
    n, h, w, c = x_nhwc.shape
    s = h * w
    t = _pick_tile(s)
    x3 = x_nhwc.reshape(n, s, c)
    out = pl.pallas_call(
        functools.partial(_pool_sum_kernel, inv_n=1.0 / float(s)),
        out_shape=jax.ShapeDtypeStruct((n, 1, c), jnp.float32),
        grid_spec=pltpu.PrefetchScalarGridSpec(
            num_scalar_prefetch=0,
            grid=(n, s // t),
            in_specs=[pl.BlockSpec((1, t, c), lambda b, si: (b, si, 0))],
            out_specs=pl.BlockSpec((1, 1, c), lambda b, si: (b, 0, 0)),
            scratch_shapes=[pltpu.VMEM((1, 1, c), jnp.float32)],
        ),
        compiler_params=pltpu.CompilerParams(
            dimension_semantics=("parallel", "arbitrary"),
            vmem_limit_bytes=_VMEM_LIMIT,
        ),
    )(x3)
    return out.reshape(n, c)


# ----------------- Kernel 2: double MLPs + sigmoid + "scale" half of conv ------------
def _channel_bias_kernel(px_ref, pg_ref, wx_ref, bx_ref, wg_ref, bg_ref,
                         ws_ref, bc_ref, bias_ref):
    # mlp_x applied twice (matches the PyTorch forward)
    tx = jnp.dot(px_ref[...], wx_ref[...], preferred_element_type=jnp.float32) + bx_ref[...]
    ax = jnp.dot(tx, wx_ref[...], preferred_element_type=jnp.float32) + bx_ref[...]
    # mlp_g applied twice (valid because F_g == F_x, as the PyTorch module requires)
    tg = jnp.dot(pg_ref[...], wg_ref[...], preferred_element_type=jnp.float32) + bg_ref[...]
    ag = jnp.dot(tg, wg_ref[...], preferred_element_type=jnp.float32) + bg_ref[...]
    scale = jax.nn.sigmoid((ax + ag) * 0.5)
    # Effective per-batch bias: scale @ W_conv[scale-channels] + conv bias.
    bias_ref[...] = (jnp.dot(scale, ws_ref[...], preferred_element_type=jnp.float32)
                     + bc_ref[...]).astype(bias_ref.dtype)


def channel_bias(pool_x, pool_g, p):
    b = pool_x.shape[0]
    cout = p["w_conv_s"].shape[1]
    return pl.pallas_call(
        _channel_bias_kernel,
        out_shape=jax.ShapeDtypeStruct((b, cout), jnp.float32),
        in_specs=[_VMEM_SPEC] * 8,
        out_specs=_VMEM_SPEC,
        compiler_params=pltpu.CompilerParams(vmem_limit_bytes=_VMEM_LIMIT),
    )(pool_x, pool_g,
      p["w_mlp_x"], p["b_mlp_x"],
      p["w_mlp_g"], p["b_mlp_g"],
      p["w_conv_s"], p["b_conv"])


# ------------------- Kernel 3: fused 1x1 conv + per-batch bias + ReLU ----------------
def _conv1x1_bias_relu_kernel(x_ref, w_ref, be_ref, o_ref):
    x = x_ref[0]                                            # (TILE_S, Cin)
    y = jnp.dot(x, w_ref[...], preferred_element_type=jnp.float32)
    y = y + be_ref[0]                                       # (1, Cout) broadcast
    o_ref[0] = jnp.maximum(y, 0.0).astype(o_ref.dtype)


def conv1x1_bias_relu(x_nhwc, w_x, bias_eff):
    n, h, w, cin = x_nhwc.shape
    cout = w_x.shape[1]
    s = h * w
    t = _pick_tile(s)
    x3 = x_nhwc.reshape(n, s, cin)
    be3 = bias_eff.reshape(n, 1, cout)
    flops = 2 * n * s * cin * cout
    bytes_accessed = 4 * (n * s * cin + cin * cout + n * cout + n * s * cout)
    out = pl.pallas_call(
        _conv1x1_bias_relu_kernel,
        out_shape=jax.ShapeDtypeStruct((n, s, cout), jnp.float32),
        grid_spec=pltpu.PrefetchScalarGridSpec(
            num_scalar_prefetch=0,
            grid=(n, s // t),
            in_specs=[pl.BlockSpec((1, t, cin), lambda b, m: (b, m, 0)),
                      pl.BlockSpec((cin, cout), lambda b, m: (0, 0)),
                      pl.BlockSpec((1, 1, cout), lambda b, m: (b, 0, 0))],
            out_specs=pl.BlockSpec((1, t, cout), lambda b, m: (b, m, 0)),
        ),
        compiler_params=pltpu.CompilerParams(
            dimension_semantics=("parallel", "parallel"),
            vmem_limit_bytes=_VMEM_LIMIT,
        ),
        cost_estimate=pl.CostEstimate(flops=flops, transcendentals=0,
                                      bytes_accessed=bytes_accessed),
    )(x3, w_x, be3)
    return out.reshape(n, h, w, cout)


# ----------------------------------- parameters --------------------------------------
def init_ccc_params(key, f_g, f_x):
    # Second application of mlp_g and the cat/conv both require F_g == F_x in PyTorch.
    assert f_g == f_x, "CCC.forward only type-checks when F_g == F_x"
    ks = jax.random.split(key, 6)

    def linear(kw, kb, fin, fout):
        bound = 1.0 / math.sqrt(fin)
        w = jax.random.uniform(kw, (fin, fout), jnp.float32, -bound, bound)
        b = jax.random.uniform(kb, (1, fout), jnp.float32, -bound, bound)
        return w, b

    w_mlp_x, b_mlp_x = linear(ks[0], ks[1], f_x, f_x)
    w_mlp_g, b_mlp_g = linear(ks[2], ks[3], f_g, f_x)
    bound = 1.0 / math.sqrt(f_x + f_g)
    w_conv = jax.random.uniform(ks[4], (f_x + f_g, f_x), jnp.float32, -bound, bound)
    b_conv = jax.random.uniform(ks[5], (1, f_x), jnp.float32, -bound, bound)
    # TODO(synk): `self.mlink` exists in the PyTorch module but is never used in forward.
    return {
        "w_mlp_x": w_mlp_x, "b_mlp_x": b_mlp_x,
        "w_mlp_g": w_mlp_g, "b_mlp_g": b_mlp_g,
        "w_conv_x": w_conv[:f_x],   # rows for the `x` channels of cat([x, scale])
        "w_conv_s": w_conv[f_x:],   # rows for the `scale` channels
        "b_conv": b_conv,
    }


# ----------------------------------- forward pass ------------------------------------
def ccc_forward(g_nchw, x_nchw, p):
    g = jnp.transpose(g_nchw, (0, 2, 3, 1))      # NCHW -> NHWC
    x = jnp.transpose(x_nchw, (0, 2, 3, 1))
    pool_x = global_avg_pool(x)                  # (B, F_x)
    pool_g = global_avg_pool(g)                  # (B, F_g)
    bias_eff = channel_bias(pool_x, pool_g, p)   # (B, F_x): scale@W_s + b_conv
    out = conv1x1_bias_relu(x, p["w_conv_x"], bias_eff)
    return jnp.transpose(out, (0, 3, 1, 2))      # NHWC -> NCHW


# ---------------------------- pure-JAX reference (spec) ------------------------------
def ccc_reference(g_nchw, x_nchw, p):
    pool_x = jnp.mean(x_nchw, axis=(2, 3))
    pool_g = jnp.mean(g_nchw, axis=(2, 3))
    tx = pool_x @ p["w_mlp_x"] + p["b_mlp_x"]
    ax = tx @ p["w_mlp_x"] + p["b_mlp_x"]
    tg = pool_g @ p["w_mlp_g"] + p["b_mlp_g"]
    ag = tg @ p["w_mlp_g"] + p["b_mlp_g"]
    scale = jax.nn.sigmoid((ax + ag) * 0.5)                       # (B, F_x)
    x_nhwc = jnp.transpose(x_nchw, (0, 2, 3, 1))
    scale_full = jnp.broadcast_to(scale[:, None, None, :], x_nhwc.shape)
    cat = jnp.concatenate([x_nhwc, scale_full], axis=-1)
    w_full = jnp.concatenate([p["w_conv_x"], p["w_conv_s"]], axis=0)
    y = jnp.maximum(cat @ w_full + p["b_conv"], 0.0)
    return jnp.transpose(y, (0, 3, 1, 2))


# --------------------------------------- main ----------------------------------------
if __name__ == "__main__":
    F_x = F_g = 32
    B, H, W = 2, 16, 16

    key = jax.random.PRNGKey(0)
    k_x, k_g, k_p = jax.random.split(key, 3)
    x = jax.random.normal(k_x, (B, F_x, H, W), jnp.float32)   # NCHW, like PyTorch
    g = jax.random.normal(k_g, (B, F_g, H, W), jnp.float32)
    params = init_ccc_params(k_p, F_g, F_x)

    fwd = jax.jit(ccc_forward)
    y = fwd(g, x, params)
    jax.block_until_ready(y)

    y_ref = ccc_reference(g, x, params)
    assert y.shape == (B, F_x, H, W), y.shape
    assert bool(jnp.all(jnp.isfinite(y)))
    assert bool(jnp.allclose(y, y_ref, rtol=5e-3, atol=5e-3)), \
        float(jnp.max(jnp.abs(y - y_ref)))
    print("KERNEL_OK")
</pallas_src>

<mosaic_0001>
module attributes {stable_mosaic.version = 11 : i64} {
  func.func @_channel_bias_kernel(%arg0: memref<2x32xf32, #tpu.memory_space<vmem>>, %arg1: memref<2x32xf32, #tpu.memory_space<vmem>>, %arg2: memref<32x32xf32, #tpu.memory_space<vmem>>, %arg3: memref<1x32xf32, #tpu.memory_space<vmem>>, %arg4: memref<32x32xf32, #tpu.memory_space<vmem>>, %arg5: memref<1x32xf32, #tpu.memory_space<vmem>>, %arg6: memref<32x32xf32, #tpu.memory_space<vmem>>, %arg7: memref<1x32xf32, #tpu.memory_space<vmem>>, %arg8: memref<2x32xf32, #tpu.memory_space<vmem>>) attributes {dimension_semantics = [], scalar_prefetch = 0 : i64, scratch_operands = 0 : i64, tpu.core_type = #tpu.core_type<tc>} {
    %c0 = arith.constant 0 : index
    %c0_0 = arith.constant 0 : index
    %0 = vector.load %arg0[%c0, %c0_0] : memref<2x32xf32, #tpu.memory_space<vmem>>, vector<2x32xf32>
    %c0_1 = arith.constant 0 : index
    %c0_2 = arith.constant 0 : index
    %1 = vector.load %arg2[%c0_1, %c0_2] : memref<32x32xf32, #tpu.memory_space<vmem>>, vector<32x32xf32>
    %cst = arith.constant dense<0.000000e+00> : vector<2x32xf32>
    %2 = tpu.matmul %0, %1, %cst {dimension_numbers = #tpu.dot_dimension_numbers<[1], [0], [0], [1], [0, 0, 1, 1], [], []>} : vector<2x32xf32>, vector<32x32xf32>, vector<2x32xf32> -> vector<2x32xf32>
    %c0_3 = arith.constant 0 : index
    %c0_4 = arith.constant 0 : index
    %3 = vector.load %arg3[%c0_3, %c0_4] : memref<1x32xf32, #tpu.memory_space<vmem>>, vector<1x32xf32>
    %4 = vector.broadcast %3 : vector<1x32xf32> to vector<2x32xf32>
    %5 = arith.addf %2, %4 : vector<2x32xf32>
    %c0_5 = arith.constant 0 : index
    %c0_6 = arith.constant 0 : index
    %6 = vector.load %arg2[%c0_5, %c0_6] : memref<32x32xf32, #tpu.memory_space<vmem>>, vector<32x32xf32>
    %cst_7 = arith.constant dense<0.000000e+00> : vector<2x32xf32>
    %7 = tpu.matmul %5, %6, %cst_7 {dimension_numbers = #tpu.dot_dimension_numbers<[1], [0], [0], [1], [0, 0, 1, 1], [], []>} : vector<2x32xf32>, vector<32x32xf32>, vector<2x32xf32> -> vector<2x32xf32>
    %c0_8 = arith.constant 0 : index
    %c0_9 = arith.constant 0 : index
    %8 = vector.load %arg3[%c0_8, %c0_9] : memref<1x32xf32, #tpu.memory_space<vmem>>, vector<1x32xf32>
    %9 = vector.broadcast %8 : vector<1x32xf32> to vector<2x32xf32>
    %10 = arith.addf %7, %9 : vector<2x32xf32>
    %c0_10 = arith.constant 0 : index
    %c0_11 = arith.constant 0 : index
    %11 = vector.load %arg1[%c0_10, %c0_11] : memref<2x32xf32, #tpu.memory_space<vmem>>, vector<2x32xf32>
    %c0_12 = arith.constant 0 : index
    %c0_13 = arith.constant 0 : index
    %12 = vector.load %arg4[%c0_12, %c0_13] : memref<32x32xf32, #tpu.memory_space<vmem>>, vector<32x32xf32>
    %cst_14 = arith.constant dense<0.000000e+00> : vector<2x32xf32>
    %13 = tpu.matmul %11, %12, %cst_14 {dimension_numbers = #tpu.dot_dimension_numbers<[1], [0], [0], [1], [0, 0, 1, 1], [], []>} : vector<2x32xf32>, vector<32x32xf32>, vector<2x32xf32> -> vector<2x32xf32>
    %c0_15 = arith.constant 0 : index
    %c0_16 = arith.constant 0 : index
    %14 = vector.load %arg5[%c0_15, %c0_16] : memref<1x32xf32, #tpu.memory_space<vmem>>, vector<1x32xf32>
    %15 = vector.broadcast %14 : vector<1x32xf32> to vector<2x32xf32>
    %16 = arith.addf %13, %15 : vector<2x32xf32>
    %c0_17 = arith.constant 0 : index
    %c0_18 = arith.constant 0 : index
    %17 = vector.load %arg4[%c0_17, %c0_18] : memref<32x32xf32, #tpu.memory_space<vmem>>, vector<32x32xf32>
    %cst_19 = arith.constant dense<0.000000e+00> : vector<2x32xf32>
    %18 = tpu.matmul %16, %17, %cst_19 {dimension_numbers = #tpu.dot_dimension_numbers<[1], [0], [0], [1], [0, 0, 1, 1], [], []>} : vector<2x32xf32>, vector<32x32xf32>, vector<2x32xf32> -> vector<2x32xf32>
    %c0_20 = arith.constant 0 : index
    %c0_21 = arith.constant 0 : index
    %19 = vector.load %arg5[%c0_20, %c0_21] : memref<1x32xf32, #tpu.memory_space<vmem>>, vector<1x32xf32>
    %20 = vector.broadcast %19 : vector<1x32xf32> to vector<2x32xf32>
    %21 = arith.addf %18, %20 : vector<2x32xf32>
    %22 = arith.addf %10, %21 : vector<2x32xf32>
    %cst_22 = arith.constant 5.000000e-01 : f32
    %23 = vector.broadcast %cst_22 : f32 to vector<2x32xf32>
    %24 = arith.mulf %22, %23 : vector<2x32xf32>
    %25 = arith.negf %24 : vector<2x32xf32>
    %26 = math.exp %25 : vector<2x32xf32>
    %cst_23 = arith.constant 1.000000e+00 : f32
    %27 = vector.broadcast %cst_23 : f32 to vector<2x32xf32>
    %28 = arith.addf %27, %26 : vector<2x32xf32>
    %29 = arith.divf %27, %28 : vector<2x32xf32>
    %c0_24 = arith.constant 0 : index
    %c0_25 = arith.constant 0 : index
    %30 = vector.load %arg6[%c0_24, %c0_25] : memref<32x32xf32, #tpu.memory_space<vmem>>, vector<32x32xf32>
    %cst_26 = arith.constant dense<0.000000e+00> : vector<2x32xf32>
    %31 = tpu.matmul %29, %30, %cst_26 {dimension_numbers = #tpu.dot_dimension_numbers<[1], [0], [0], [1], [0, 0, 1, 1], [], []>} : vector<2x32xf32>, vector<32x32xf32>, vector<2x32xf32> -> vector<2x32xf32>
    %c0_27 = arith.constant 0 : index
    %c0_28 = arith.constant 0 : index
    %32 = vector.load %arg7[%c0_27, %c0_28] : memref<1x32xf32, #tpu.memory_space<vmem>>, vector<1x32xf32>
    %33 = vector.broadcast %32 : vector<1x32xf32> to vector<2x32xf32>
    %34 = arith.addf %31, %33 : vector<2x32xf32>
    %c0_29 = arith.constant 0 : index
    %c0_30 = arith.constant 0 : index
    %35 = vector.load %arg8[%c0_29, %c0_30] : memref<2x32xf32, #tpu.memory_space<vmem>>, vector<2x32xf32>
    tpu.vector_store %arg8[%c0_29, %c0_30], %34 {strides = array<i32>} : memref<2x32xf32, #tpu.memory_space<vmem>>, vector<2x32xf32>,
    return
  }
}

module attributes {stable_mosaic.version = 11 : i64} {
  func.func @_conv1x1_bias_relu_kernel(%arg0: i32, %arg1: i32, %arg2: memref<1x256x32xf32, #tpu.memory_space<vmem>>, %arg3: memref<32x32xf32, #tpu.memory_space<vmem>>, %arg4: memref<1x1x32xf32, #tpu.memory_space<vmem>>, %arg5: memref<1x256x32xf32, #tpu.memory_space<vmem>>) attributes {dimension_semantics = [#tpu.dimension_semantics<parallel>, #tpu.dimension_semantics<parallel>], iteration_bounds = array<i64: 2, 1>, scalar_prefetch = 0 : i64, scratch_operands = 0 : i64, tpu.core_type = #tpu.core_type<tc>, window_params = [{transform_indices = @transform_0, window_bounds = array<i64: 1, 256, 32>}, {pipeline_mode = #tpu.pipeline_mode<synchronous>, transform_indices = @transform_1, window_bounds = array<i64: 32, 32>}, {transform_indices = @transform_2, window_bounds = array<i64: 1, 1, 32>}, {transform_indices = @transform_3, window_bounds = array<i64: 1, 256, 32>}]} {
    %c0 = arith.constant 0 : index
    %c0_0 = arith.constant 0 : index
    %c0_1 = arith.constant 0 : index
    %0 = vector.load %arg2[%c0, %c0_0, %c0_1] : memref<1x256x32xf32, #tpu.memory_space<vmem>>, vector<1x256x32xf32>
    %1 = vector.shape_cast %0 : vector<1x256x32xf32> to vector<256x32xf32>
    %c0_2 = arith.constant 0 : index
    %c0_3 = arith.constant 0 : index
    %2 = vector.load %arg3[%c0_2, %c0_3] : memref<32x32xf32, #tpu.memory_space<vmem>>, vector<32x32xf32>
    %cst = arith.constant dense<0.000000e+00> : vector<256x32xf32>
    %3 = tpu.matmul %1, %2, %cst {dimension_numbers = #tpu.dot_dimension_numbers<[1], [0], [0], [1], [0, 0, 1, 1], [], []>} : vector<256x32xf32>, vector<32x32xf32>, vector<256x32xf32> -> vector<256x32xf32>
    %c0_4 = arith.constant 0 : index
    %c0_5 = arith.constant 0 : index
    %c0_6 = arith.constant 0 : index
    %4 = vector.load %arg4[%c0_4, %c0_5, %c0_6] : memref<1x1x32xf32, #tpu.memory_space<vmem>>, vector<1x1x32xf32>
    %5 = vector.shape_cast %4 : vector<1x1x32xf32> to vector<1x32xf32>
    %6 = vector.broadcast %5 : vector<1x32xf32> to vector<256x32xf32>
    %7 = arith.addf %3, %6 : vector<256x32xf32>
    %cst_7 = arith.constant 0.000000e+00 : f32
    %8 = vector.broadcast %cst_7 : f32 to vector<256x32xf32>
    %9 = arith.maximumf %7, %8 : vector<256x32xf32>
    %c0_8 = arith.constant 0 : index
    %c0_9 = arith.constant 0 : index
    %c0_10 = arith.constant 0 : index
    %10 = vector.load %arg5[%c0_8, %c0_9, %c0_10] : memref<1x256x32xf32, #tpu.memory_space<vmem>>, vector<1x256x32xf32>
    %11 = vector.shape_cast %10 : vector<1x256x32xf32> to vector<256x32xf32>
    %12 = vector.shape_cast %9 : vector<256x32xf32> to vector<1x256x32xf32>
    tpu.vector_store %arg5[%c0_8, %c0_9, %c0_10], %12 {strides = array<i32>} : memref<1x256x32xf32, #tpu.memory_space<vmem>>, vector<1x256x32xf32>,
    return
  }
  func.func @transform_0(%arg0: i32, %arg1: i32) -> (i32, i32, i32) {
    %c0_i32 = arith.constant 0 : i32
    %c0_i32_0 = arith.constant 0 : i32
    return %arg0, %arg1, %c0_i32 : i32, i32, i32
  }
  func.func @transform_1(%arg0: i32, %arg1: i32) -> (i32, i32) {
    %c0_i32 = arith.constant 0 : i32
    %c0_i32_0 = arith.constant 0 : i32
    %c0_i32_1 = arith.constant 0 : i32
    return %c0_i32, %c0_i32_0 : i32, i32
  }
  func.func @transform_2(%arg0: i32, %arg1: i32) -> (i32, i32, i32) {
    %c0_i32 = arith.constant 0 : i32
    %c0_i32_0 = arith.constant 0 : i32
    %c0_i32_1 = arith.constant 0 : i32
    return %arg0, %c0_i32, %c0_i32_0 : i32, i32, i32
  }
  func.func @transform_3(%arg0: i32, %arg1: i32) -> (i32, i32, i32) {
    %c0_i32 = arith.constant 0 : i32
    %c0_i32_0 = arith.constant 0 : i32
    return %arg0, %arg1, %c0_i32 : i32, i32, i32
  }
}

module attributes {stable_mosaic.version = 11 : i64} {
  func.func @_pool_sum_kernel(%arg0: i32, %arg1: i32, %arg2: memref<1x256x32xf32, #tpu.memory_space<vmem>>, %arg3: memref<1x1x32xf32, #tpu.memory_space<vmem>>, %arg4: memref<1x1x32xf32, #tpu.memory_space<vmem>>) attributes {dimension_semantics = [#tpu.dimension_semantics<parallel>, #tpu.dimension_semantics<arbitrary>], iteration_bounds = array<i64: 2, 1>, scalar_prefetch = 0 : i64, scratch_operands = 1 : i64, tpu.core_type = #tpu.core_type<tc>, window_params = [{transform_indices = @transform_0, window_bounds = array<i64: 1, 256, 32>}, {transform_indices = @transform_1, window_bounds = array<i64: 1, 1, 32>}]} {
    %c0_i32 = arith.constant 0 : i32
    %0 = arith.cmpi eq, %arg1, %c0_i32 : i32
    %1 = arith.extui %0 : i1 to i32
    %c0_i32_0 = arith.constant 0 : i32
    %2 = arith.cmpi ne, %1, %c0_i32_0 : i32
    scf.if %2 {
      %cst_11 = arith.constant 0.000000e+00 : f32
      %12 = vector.broadcast %cst_11 : f32 to vector<1x1x32xf32>
      %c0_12 = arith.constant 0 : index
      %c0_13 = arith.constant 0 : index
      %c0_14 = arith.constant 0 : index
      %13 = vector.load %arg4[%c0_12, %c0_13, %c0_14] : memref<1x1x32xf32, #tpu.memory_space<vmem>>, vector<1x1x32xf32>
      tpu.vector_store %arg4[%c0_12, %c0_13, %c0_14], %12 {strides = array<i32>} : memref<1x1x32xf32, #tpu.memory_space<vmem>>, vector<1x1x32xf32>,
    } else {
    }
    %c0 = arith.constant 0 : index
    %c0_1 = arith.constant 0 : index
    %c0_2 = arith.constant 0 : index
    %3 = vector.load %arg4[%c0, %c0_1, %c0_2] : memref<1x1x32xf32, #tpu.memory_space<vmem>>, vector<1x1x32xf32>
    %c0_3 = arith.constant 0 : index
    %c0_4 = arith.constant 0 : index
    %c0_5 = arith.constant 0 : index
    %4 = vector.load %arg2[%c0_3, %c0_4, %c0_5] : memref<1x256x32xf32, #tpu.memory_space<vmem>>, vector<1x256x32xf32>
    %cst = arith.constant dense<0.000000e+00> : vector<1x32xf32>
    %5 = vector.multi_reduction <add>, %4, %cst [1] : vector<1x256x32xf32> to vector<1x32xf32>
    %6 = vector.shape_cast %5 : vector<1x32xf32> to vector<1x1x32xf32>
    %7 = arith.addf %3, %6 : vector<1x1x32xf32>
    %c0_6 = arith.constant 0 : index
    %c0_7 = arith.constant 0 : index
    %c0_8 = arith.constant 0 : index
    %8 = vector.load %arg4[%c0_6, %c0_7, %c0_8] : memref<1x1x32xf32, #tpu.memory_space<vmem>>, vector<1x1x32xf32>
    tpu.vector_store %arg4[%c0_6, %c0_7, %c0_8], %7 {strides = array<i32>} : memref<1x1x32xf32, #tpu.memory_space<vmem>>, vector<1x1x32xf32>,
    %c0_i32_9 = arith.constant 0 : i32
    %9 = arith.cmpi eq, %arg1, %c0_i32_9 : i32
    %10 = arith.extui %9 : i1 to i32
    %c0_i32_10 = arith.constant 0 : i32
    %11 = arith.cmpi ne, %10, %c0_i32_10 : i32
    scf.if %11 {
      %c0_11 = arith.constant 0 : index
      %c0_12 = arith.constant 0 : index
      %c0_13 = arith.constant 0 : index
      %12 = vector.load %arg4[%c0_11, %c0_12, %c0_13] : memref<1x1x32xf32, #tpu.memory_space<vmem>>, vector<1x1x32xf32>
      %cst_14 = arith.constant 3.906250e-03 : f32
      %13 = vector.broadcast %cst_14 : f32 to vector<1x1x32xf32>
      %14 = arith.mulf %12, %13 : vector<1x1x32xf32>
      %c0_15 = arith.constant 0 : index
      %c0_16 = arith.constant 0 : index
      %c0_17 = arith.constant 0 : index
      %15 = vector.load %arg3[%c0_15, %c0_16, %c0_17] : memref<1x1x32xf32, #tpu.memory_space<vmem>>, vector<1x1x32xf32>
      tpu.vector_store %arg3[%c0_15, %c0_16, %c0_17], %14 {strides = array<i32>} : memref<1x1x32xf32, #tpu.memory_space<vmem>>, vector<1x1x32xf32>,
    } else {
    }
    return
  }
  func.func @transform_0(%arg0: i32, %arg1: i32) -> (i32, i32, i32) {
    %c0_i32 = arith.constant 0 : i32
    %c0_i32_0 = arith.constant 0 : i32
    return %arg0, %arg1, %c0_i32 : i32, i32, i32
  }
  func.func @transform_1(%arg0: i32, %arg1: i32) -> (i32, i32, i32) {
    %c0_i32 = arith.constant 0 : i32
    %c0_i32_0 = arith.constant 0 : i32
    %c0_i32_1 = arith.constant 0 : i32
    return %arg0, %c0_i32, %c0_i32_0 : i32, i32, i32
  }
}

module attributes {stable_mosaic.version = 11 : i64} {
  func.func @_pool_sum_kernel(%arg0: i32, %arg1: i32, %arg2: memref<1x256x32xf32, #tpu.memory_space<vmem>>, %arg3: memref<1x1x32xf32, #tpu.memory_space<vmem>>, %arg4: memref<1x1x32xf32, #tpu.memory_space<vmem>>) attributes {dimension_semantics = [#tpu.dimension_semantics<parallel>, #tpu.dimension_semantics<arbitrary>], iteration_bounds = array<i64: 2, 1>, scalar_prefetch = 0 : i64, scratch_operands = 1 : i64, tpu.core_type = #tpu.core_type<tc>, window_params = [{transform_indices = @transform_0, window_bounds = array<i64: 1, 256, 32>}, {transform_indices = @transform_1, window_bounds = array<i64: 1, 1, 32>}]} {
    %c0_i32 = arith.constant 0 : i32
    %0 = arith.cmpi eq, %arg1, %c0_i32 : i32
    %1 = arith.extui %0 : i1 to i32
    %c0_i32_0 = arith.constant 0 : i32
    %2 = arith.cmpi ne, %1, %c0_i32_0 : i32
    scf.if %2 {
      %cst_11 = arith.constant 0.000000e+00 : f32
      %12 = vector.broadcast %cst_11 : f32 to vector<1x1x32xf32>
      %c0_12 = arith.constant 0 : index
      %c0_13 = arith.constant 0 : index
      %c0_14 = arith.constant 0 : index
      %13 = vector.load %arg4[%c0_12, %c0_13, %c0_14] : memref<1x1x32xf32, #tpu.memory_space<vmem>>, vector<1x1x32xf32>
      tpu.vector_store %arg4[%c0_12, %c0_13, %c0_14], %12 {strides = array<i32>} : memref<1x1x32xf32, #tpu.memory_space<vmem>>, vector<1x1x32xf32>,
    } else {
    }
    %c0 = arith.constant 0 : index
    %c0_1 = arith.constant 0 : index
    %c0_2 = arith.constant 0 : index
    %3 = vector.load %arg4[%c0, %c0_1, %c0_2] : memref<1x1x32xf32, #tpu.memory_space<vmem>>, vector<1x1x32xf32>
    %c0_3 = arith.constant 0 : index
    %c0_4 = arith.constant 0 : index
    %c0_5 = arith.constant 0 : index
    %4 = vector.load %arg2[%c0_3, %c0_4, %c0_5] : memref<1x256x32xf32, #tpu.memory_space<vmem>>, vector<1x256x32xf32>
    %cst = arith.constant dense<0.000000e+00> : vector<1x32xf32>
    %5 = vector.multi_reduction <add>, %4, %cst [1] : vector<1x256x32xf32> to vector<1x32xf32>
    %6 = vector.shape_cast %5 : vector<1x32xf32> to vector<1x1x32xf32>
    %7 = arith.addf %3, %6 : vector<1x1x32xf32>
    %c0_6 = arith.constant 0 : index
    %c0_7 = arith.constant 0 : index
    %c0_8 = arith.constant 0 : index
    %8 = vector.load %arg4[%c0_6, %c0_7, %c0_8] : memref<1x1x32xf32, #tpu.memory_space<vmem>>, vector<1x1x32xf32>
    tpu.vector_store %arg4[%c0_6, %c0_7, %c0_8], %7 {strides = array<i32>} : memref<1x1x32xf32, #tpu.memory_space<vmem>>, vector<1x1x32xf32>,
    %c0_i32_9 = arith.constant 0 : i32
    %9 = arith.cmpi eq, %arg1, %c0_i32_9 : i32
    %10 = arith.extui %9 : i1 to i32
    %c0_i32_10 = arith.constant 0 : i32
    %11 = arith.cmpi ne, %10, %c0_i32_10 : i32
    scf.if %11 {
      %c0_11 = arith.constant 0 : index
      %c0_12 = arith.constant 0 : index
      %c0_13 = arith.constant 0 : index
      %12 = vector.load %arg4[%c0_11, %c0_12, %c0_13] : memref<1x1x32xf32, #tpu.memory_space<vmem>>, vector<1x1x32xf32>
      %cst_14 = arith.constant 3.906250e-03 : f32
      %13 = vector.broadcast %cst_14 : f32 to vector<1x1x32xf32>
      %14 = arith.mulf %12, %13 : vector<1x1x32xf32>
      %c0_15 = arith.constant 0 : index
      %c0_16 = arith.constant 0 : index
      %c0_17 = arith.constant 0 : index
      %15 = vector.load %arg3[%c0_15, %c0_16, %c0_17] : memref<1x1x32xf32, #tpu.memory_space<vmem>>, vector<1x1x32xf32>
      tpu.vector_store %arg3[%c0_15, %c0_16, %c0_17], %14 {strides = array<i32>} : memref<1x1x32xf32, #tpu.memory_space<vmem>>, vector<1x1x32xf32>,
    } else {
    }
    return
  }
  func.func @transform_0(%arg0: i32, %arg1: i32) -> (i32, i32, i32) {
    %c0_i32 = arith.constant 0 : i32
    %c0_i32_0 = arith.constant 0 : i32
    return %arg0, %arg1, %c0_i32 : i32, i32, i32
  }
  func.func @transform_1(%arg0: i32, %arg1: i32) -> (i32, i32, i32) {
    %c0_i32 = arith.constant 0 : i32
    %c0_i32_0 = arith.constant 0 : i32
    %c0_i32_1 = arith.constant 0 : i32
    return %arg0, %c0_i32, %c0_i32_0 : i32, i32, i32
  }
}

</mosaic_0001>

<bundles_post_ra>
// kernel: ccc_forward.5
= control target key start
LH: loop header
LB: loop body
LE: loop exit
PB: predicated region body
PF: predicated region fallthrough
CT: control target
= control target key end

     0   :  { %6 = vsyncpa [#allocation4], 0  ;;  %s667_s0 = inlined_call_operand.hbm [shape: f32[2,256,32], index: 0, kind: input, shape index: {}]   ;;  %s668_s1 = inlined_call_operand.vmem [shape: f32[2,1,32], index: 1, kind: output, shape index: {}]  }
   0x1   :  { %8 = vsyncpa [#allocation4 + $0x1], 0  ;;  %s502_s6 = smov 0   ;;  %s504_s7 = smov 0  }
   0x2   :  { %s506_s8 = smov 0   ;;  %s508_s9 = smov 0  }
   0x3   :  { %s510_s10 = smov 0   ;;  %s512_s11 = smov 0  }
   0x4 LB: > { %s338_s12 = sadd.s32 4294967295, %s486_s11   ;;  %s26_s13 = sadd.s32 1, %s482_s10  ;;  %s486_s11 = sphi %s512_s11, %s14_s11   ;;  %s482_s10 = sphi %s510_s10, %s676_s10   ;;  %s478_s9 = sphi %s508_s9, %s675_s9   ;;  %s474_s8 = sphi %s506_s8, %s674_s8   ;;  %s470_s7 = sphi %s504_s7, %s673_s7   ;;  %s466_s6 = sphi %s502_s6, %s672_s6  }
   0x5   : > { %p28_p0 = scmp.ge.s32.totalorder %s26_s13, 2  ;;  %s35_s14 = sadd.s32 1, %s474_s8 }
   0x6   : > { %p42_p1 = scmp.ne.s32.totalorder %s474_s8, %s470_s7  ;;  %p43_p2 = scmp.eq.s32.totalorder %s486_s11, 0 }
   0x7   : > { %s678_s13 = smov (%p28_p0, %s26_s13), 0  ;;  %p48_p4 = scmp.ne.s32.totalorder %s470_s7, %s466_s6 }
   0x8   : > { %p538_p3 = por %p43_p2, %p42_p1  ;;  %s30_s16 = ssub.s32 %s482_s10, %s678_s13 }
   0x9   : > { %p49_p5 = scmp.eq.s32.totalorder %s338_s12, 0  ;;  %p33_p6 = scmp.eq.s32.totalorder %s30_s16, 0 }
   0xa   : > { %p356_p8 = scmp.lt.s32.totalorder %s486_s11, 2  ;;  %s98_s19 = sand.u32 1, %s474_s8  }
   0xb   : > { %p545_p7 = por %p49_p5, %p48_p4  ;;  %s349_s20 = sshll.u32 %s482_s10, 12 }
   0xc   : > { %s551_s18 = scalar_select %p33_p6, %s474_s8, %s35_s14  }
   0xd   : > { %s342_s21 = sshll.u32 %s98_s19, 8  ;;  %s110_s24 = scalar_lea.hbm %s667_s0, %s349_s20 }
   0xe   : > { %s102_s25 = scalar_lea.vmem [#allocation3], %s342_s21  ;;  %p560_p9 = pnand %p356_p8, %p538_p3 }
   0xf   : > { %s111_s26 = sshll.u32 %s102_s25, 4  ;;  %s99_s28 = scalar_lea.sflag [#allocation4], %s98_s19  ;;  %s112_s26 = int_to_ptr.vmem [resolvable:$true] %s111_s26 }
  0x10   : > { %p410_p10 = pneg %p560_p9  ;;  %s421_s29 = scalar_lea.vmem %s112_s26, 4096 }
  0x11   : > { %p422_p11 = scmp.ne.s32.totalorder %s112_s26, %s421_s29  ;;  %s488_s30 = smov [#allocation3]  }
  0x12   : > { %s426_s2 = sshll.u32 %s488_s30, 4  ;;  %s427_s2 = int_to_ptr.vmem [resolvable:$false] %s426_s2 }
  0x13   : > { %p424_p12 = pnand %p422_p11, %p410_p10  ;;  %s428_s3 = scalar_lea.vmem %s427_s2, 8192 }
  0x14   : > { %p429_p0 = scmp.lt.s32.totalorder %s112_s26, %s427_s2  ;;  %p430_p1 = scmp.lt.s32.totalorder %s428_s3, %s421_s29 }
  0x15   : > { %p425_p13 = pneg %p424_p12 }
  0x16   : > { %p431_p2 = por %p430_p1, %p429_p0 }
  0x18   : > { %p432_p3 = pnand %p431_p2, %p425_p13 }
  0x1a   : > { %435 = shalt.err (!%p432_p3)
}
  0x1b   : > { %s489_s4 = smov 128   ;;  %s490_s5 = smov 8  }
  0x1c   : > { %355 = dma.hbm_to_vmem [thread:$0]  (!%p560_p9), %s110_s24, 4096, %s112_s26, %s99_s28, %s489_s4, %s489_s4, %s490_s5  }
  0x1d   : > { %p345_p4 = scmp.ge.s32.totalorder %s486_s11, 1  ;;  %p119_p5 = scmp.lt.s32.totalorder %s486_s11, 3 }
  0x1f   : > { %p120_p6 = pnand %p345_p4, %p119_p5 }
  0x20   : > { %s125_s6 = sand.u32 (!%p120_p6), 1, %s470_s7  }
  0x21   : > { %123 = sbr.rel (%p120_p6) target bundleno = 128 (0x80), region = 24  ;;  %s346_s12 = sshll.u32 (!%p120_p6), %s125_s6, 8 }
  0x22   : > { %s126_s14 = scalar_lea.sflag (!%p120_p6), [#allocation4], %s125_s6  ;;  %s571_s15 = scalar_lea.vmem (!%p120_p6), [#allocation3], %s346_s12 }
  0x26   : > { %461 = dma.done.wait (%p545_p7), %s126_s14, 4096  }
  0x27   : > { %463 = vsyncadd (%p545_p7), %s126_s14, 4294963200  ;;  %vm154_vm0 = vcmask 253952   ;;  %v491_v0 = vmov 0.0   ;;  %vm189_vm1 = vcmask 261120   ;;  %v157_v1 = vld [vmem:[%s571_s15] sm:$0xff]  ;;  %v158_v2 = vld [vmem:[%s571_s15 + $0x8] sm:$0xff] }
  0x28   : > { %155 = vst.msk [vmem:[#allocation2] sm:$0x1] %vm154_vm0, %v491_v0  ;;  %v159_v3 = vld [vmem:[%s571_s15 + $0x10] sm:$0xff]  ;;  %v160_v4 = vld [vmem:[%s571_s15 + $0x18] sm:$0xff]  ;;  %v190_v5 = vsel %vm189_vm1, %v157_v1, 0.0  ;;  %v191_v6 = vsel %vm189_vm1, %v158_v2, 0.0 }
  0x29   : > { %v161_v7 = vld [vmem:[%s571_s15 + $0x20] sm:$0xff]  ;;  %v192_v8 = vadd.f32 %v191_v6, %v190_v5  ;;  %v193_v9 = vsel %vm189_vm1, %v159_v3, 0.0  ;;  %v195_v10 = vsel %vm189_vm1, %v160_v4, 0.0  ;;  %v162_v11 = vld [vmem:[%s571_s15 + $0x28] sm:$0xff]  ;;  %v163_v14 = vld [vmem:[%s571_s15 + $0x30] sm:$0xff]  ;;  %p147_p7 = scmp.lt.s32.totalorder %s478_s9, 1 }
  0x2a   : > { %v197_v13 = vsel %vm189_vm1, %v161_v7, 0.0  ;;  %v199_v16 = vsel %vm189_vm1, %v162_v11, 0.0  ;;  %v164_v17 = vld [vmem:[%s571_s15 + $0x38] sm:$0xff]  ;;  %v201_v19 = vsel %vm189_vm1, %v163_v14, 0.0  ;;  %v165_v20 = vld [vmem:[%s571_s15 + $0x40] sm:$0xff]  ;;  %v166_v23 = vld [vmem:[%s571_s15 + $0x48] sm:$0xff] }
  0x2b   : > { %v194_v12 = vadd.f32 %v193_v9, %v192_v8  ;;  %v203_v22 = vsel %vm189_vm1, %v164_v17, 0.0  ;;  %v205_v25 = vsel %vm189_vm1, %v165_v20, 0.0  ;;  %v167_v26 = vld [vmem:[%s571_s15 + $0x50] sm:$0xff]  ;;  %v207_v28 = vsel %vm189_vm1, %v166_v23, 0.0  ;;  %v168_v29 = vld [vmem:[%s571_s15 + $0x58] sm:$0xff]  ;;  %v169_v32 = vld [vmem:[%s571_s15 + $0x60] sm:$0xff] }
  0x2c   : > { %v209_v31 = vsel %vm189_vm1, %v167_v26, 0.0  ;;  %v211_v34 = vsel %vm189_vm1, %v168_v29, 0.0  ;;  %v170_v35 = vld [vmem:[%s571_s15 + $0x68] sm:$0xff]  ;;  %v213_v37 = vsel %vm189_vm1, %v169_v32, 0.0  ;;  %v171_v38 = vld [vmem:[%s571_s15 + $0x70] sm:$0xff]  ;;  %v172_v41 = vld [vmem:[%s571_s15 + $0x78] sm:$0xff] }
  0x2d   : > { %v196_v15 = vadd.f32 %v195_v10, %v194_v12  ;;  %v215_v40 = vsel %vm189_vm1, %v170_v35, 0.0  ;;  %v217_v43 = vsel %vm189_vm1, %v171_v38, 0.0  ;;  %v173_v44 = vld [vmem:[%s571_s15 + $0x80] sm:$0xff]  ;;  %v219_v46 = vsel %vm189_vm1, %v172_v41, 0.0  ;;  %v174_v47 = vld [vmem:[%s571_s15 + $0x88] sm:$0xff]  ;;  %v175_v50 = vld [vmem:[%s571_s15 + $0x90] sm:$0xff] }
  0x2e   : > { %v221_v49 = vsel %vm189_vm1, %v173_v44, 0.0  ;;  %v223_v52 = vsel %vm189_vm1, %v174_v47, 0.0  ;;  %v176_v53 = vld [vmem:[%s571_s15 + $0x98] sm:$0xff]  ;;  %v225_v55 = vsel %vm189_vm1, %v175_v50, 0.0  ;;  %v177_v56 = vld [vmem:[%s571_s15 + $0xa0] sm:$0xff]  ;;  %v178_v59 = vld [vmem:[%s571_s15 + $0xa8] sm:$0xff] }
  0x2f   : > { %v198_v18 = vadd.f32 %v197_v13, %v196_v15  ;;  %v227_v58 = vsel %vm189_vm1, %v176_v53, 0.0  ;;  %v229_v61 = vsel %vm189_vm1, %v177_v56, 0.0  ;;  %v179_v62 = vld [vmem:[%s571_s15 + $0xb0] sm:$0xff]  ;;  %v231_v0 = vsel %vm189_vm1, %v178_v59, 0.0  ;;  %v180_v1 = vld [vmem:[%s571_s15 + $0xb8] sm:$0xff]  ;;  %v181_v4 = vld [vmem:[%s571_s15 + $0xc0] sm:$0xff] }
  0x30   : > { %v233_v3 = vsel %vm189_vm1, %v179_v62, 0.0  ;;  %v235_v6 = vsel %vm189_vm1, %v180_v1, 0.0  ;;  %v182_v7 = vld [vmem:[%s571_s15 + $0xc8] sm:$0xff]  ;;  %v237_v9 = vsel %vm189_vm1, %v181_v4, 0.0  ;;  %v183_v10 = vld [vmem:[%s571_s15 + $0xd0] sm:$0xff]  ;;  %v184_v13 = vld [vmem:[%s571_s15 + $0xd8] sm:$0xff] }
  0x31   : > { %v200_v21 = vadd.f32 %v199_v16, %v198_v18  ;;  %v239_v12 = vsel %vm189_vm1, %v182_v7, 0.0  ;;  %v241_v15 = vsel %vm189_vm1, %v183_v10, 0.0  ;;  %v185_v16 = vld [vmem:[%s571_s15 + $0xe0] sm:$0xff]  ;;  %v243_v18 = vsel %vm189_vm1, %v184_v13, 0.0  ;;  %s680_s9 = smov (!%p147_p7, %s478_s9), 1 }
  0x32   : > { %s149_s19 = scalar_lea.vmem %s668_s1, %s680_s9 }
  0x33   : > { %v202_v24 = vadd.f32 %v201_v19, %v200_v21  ;;  %v186_v19 = vld [vmem:[%s571_s15 + $0xe8] sm:$0xff]  ;;  %v245_v21 = vsel %vm189_vm1, %v185_v16, 0.0 }
  0x35   : > { %v204_v27 = vadd.f32 %v203_v22, %v202_v24  ;;  %v187_v22 = vld [vmem:[%s571_s15 + $0xf0] sm:$0xff]  ;;  %v247_v24 = vsel %vm189_vm1, %v186_v19, 0.0 }
  0x37   : > { %v206_v30 = vadd.f32 %v205_v25, %v204_v27  ;;  %v188_v25 = vld [vmem:[%s571_s15 + $0xf8] sm:$0xff]  ;;  %v249_v27 = vsel %vm189_vm1, %v187_v22, 0.0 }
  0x38   : > { %v251_v29 = vsel %vm189_vm1, %v188_v25, 0.0 }
  0x39   : > { %v208_v33 = vadd.f32 %v207_v28, %v206_v30 }
  0x3b   : > { %v210_v36 = vadd.f32 %v209_v31, %v208_v33 }
  0x3d   : > { %v212_v39 = vadd.f32 %v211_v34, %v210_v36 }
  0x3f   : > { %v214_v42 = vadd.f32 %v213_v37, %v212_v39  ;;  %v156_v37 = vld [vmem:[#allocation2] sm:$0x1] }
  0x41   : > { %v216_v45 = vadd.f32 %v215_v40, %v214_v42 }
  0x43   : > { %v218_v48 = vadd.f32 %v217_v43, %v216_v45 }
  0x45   : > { %v220_v51 = vadd.f32 %v219_v46, %v218_v48 }
  0x47   : > { %v222_v54 = vadd.f32 %v221_v49, %v220_v51 }
  0x49   : > { %v224_v57 = vadd.f32 %v223_v52, %v222_v54 }
  0x4b   : > { %v226_v60 = vadd.f32 %v225_v55, %v224_v57 }
  0x4d   : > { %v228_v63 = vadd.f32 %v227_v58, %v226_v60 }
  0x4f   : > { %v230_v2 = vadd.f32 %v229_v61, %v228_v63 }
  0x51   : > { %v232_v5 = vadd.f32 %v231_v0, %v230_v2 }
  0x53   : > { %v234_v8 = vadd.f32 %v233_v3, %v232_v5 }
  0x55   : > { %v236_v11 = vadd.f32 %v235_v6, %v234_v8 }
  0x57   : > { %v238_v14 = vadd.f32 %v237_v9, %v236_v11 }
  0x59   : > { %v240_v17 = vadd.f32 %v239_v12, %v238_v14 }
  0x5b   : > { %v242_v20 = vadd.f32 %v241_v15, %v240_v17 }
  0x5d   : > { %v244_v23 = vadd.f32 %v243_v18, %v242_v20 }
  0x5f   : > { %v246_v26 = vadd.f32 %v245_v21, %v244_v23 }
  0x61   : > { %v248_v28 = vadd.f32 %v247_v24, %v246_v26 }
  0x63   : > { %v250_v30 = vadd.f32 %v249_v27, %v248_v28 }
  0x65   : > { %v252_v31 = vadd.f32 %v251_v29, %v250_v30 }
  0x67   : > { %v253_v32 = vrot.slane %v252_v31, 4 }
  0x69   : > { %v254_v33 = vadd.f32 %v253_v32, %v252_v31 }
  0x6b   : > { %v255_v34 = vrot.slane %v254_v33, 2 }
  0x6d   : > { %v256_v35 = vadd.f32 %v255_v34, %v254_v33 }
  0x6f   : > { %v257_v36 = vrot.slane %v256_v35, 1 }
  0x71   : > { %v258_v38 = vadd.f32 %v257_v36, %v256_v35 }
  0x73   : > { %v259_v39 = vadd.f32 %v258_v38, %v156_v37 }
  0x75   : > { %261 = vst.msk [vmem:[#allocation2] sm:$0x1] %vm154_vm0, %v259_v39 }
  0x7c   : > { %v265_v40 = vld [vmem:[#allocation2] sm:$0x1] }
  0x7d   : > { %v266_v41 = vmul.f32 0.00390625, %v265_v40 }
  0x7f   : > { %267 = vst.msk [vmem:[%s149_s19] sm:$0x1] %vm154_vm0, %v266_v41 }
  0x80 PF: > { %s14_s11 = sadd.s32 1, %s486_s11   ;;  %s672_s6 = smov %s470_s7 }
  0x81   : > { %p11_p8 = scmp.ge.s32.totalorder %s14_s11, 4   ;;  %s673_s7 = smov %s474_s8 }
  0x82   : > { %s674_s8 = smov %s551_s18  ;;  %s675_s9 = smov %s482_s10 }
  0x83   : > { %s676_s10 = smov %s678_s13  ;;  %13 = sbr.rel (!%p11_p8) target bundleno = 4 (0x4), region = 72 }
  0x88   :  { %285 = vsyncpa [#allocation4], 1 }
  0x89   :  { %287 = vsyncpa [#allocation4 + $0x1], 1 }

// kernel: ccc_forward.4
= control target key start
LH: loop header
LB: loop body
LE: loop exit
PB: predicated region body
PF: predicated region fallthrough
CT: control target
= control target key end

     0   :  { %s390_s6 = smov 0   ;;  %s392_s7 = smov 0   ;;  %s496_s0 = inlined_call_operand.vmem [shape: f32[2,256,32], index: 0, kind: input, shape index: {}]   ;;  %s497_s1 = inlined_call_operand.vmem [shape: f32[2,1,32], index: 1, kind: output, shape index: {}]  }
   0x1   :  { %s394_s8 = smov 0  }
   0x2 LB: > { %s23_s9 = sadd.s32 1, %s373_s7  ;;  %p324_p0 = scmp.ge.s32.totalorder %s377_s8, 1  ;;  %s377_s8 = sphi %s394_s8, %s11_s8   ;;  %s373_s7 = sphi %s392_s7, %s499_s7   ;;  %s369_s6 = sphi %s390_s6, %s498_s6  }
   0x3   : > { %p25_p1 = scmp.ge.s32.totalorder %s23_s9, 2  ;;  %p106_p2 = scmp.lt.s32.totalorder %s377_s8, 3 }
   0x5   : > { %s501_s9 = smov (%p25_p1, %s23_s9), 0  ;;  %p107_p3 = pnand %p324_p0, %p106_p2 }
   0x6   : > { %p129_p4 = scmp.lt.s32.totalorder (!%p107_p3), %s369_s6, 1 }
   0x7   : > { %110 = sbr.rel (%p107_p3) target bundleno = 104 (0x68), region = 24 }
   0xc   : > { %vm145_vm0 = vcmask 253952   ;;  %v379_v0 = vmov 0.0   ;;  %s503_s6 = smov (!%p129_p4, %s369_s6), 1  ;;  %vm180_vm1 = vcmask 261120  }
   0xd   : > { %146 = vst.msk [vmem:[#allocation2] sm:$0x1] %vm145_vm0, %v379_v0  ;;  %s329_s10 = sshll.u32 %s503_s6, 8  ;;  %s140_s16 = scalar_lea.vmem %s497_s1, %s503_s6 }
   0xe   : > { %s415_s13 = scalar_lea.vmem %s496_s0, %s329_s10 }
   0xf   : > { %v148_v1 = vld [vmem:[%s415_s13] sm:$0xff]  ;;  %v149_v2 = vld [vmem:[%s415_s13 + $0x8] sm:$0xff]  ;;  %v150_v3 = vld [vmem:[%s415_s13 + $0x10] sm:$0xff] }
  0x10   : > { %v151_v4 = vld [vmem:[%s415_s13 + $0x18] sm:$0xff]  ;;  %v181_v5 = vsel %vm180_vm1, %v148_v1, 0.0  ;;  %v182_v6 = vsel %vm180_vm1, %v149_v2, 0.0  ;;  %v184_v7 = vsel %vm180_vm1, %v150_v3, 0.0  ;;  %v152_v8 = vld [vmem:[%s415_s13 + $0x20] sm:$0xff]  ;;  %v153_v11 = vld [vmem:[%s415_s13 + $0x28] sm:$0xff] }
  0x11   : > { %v183_v9 = vadd.f32 %v182_v6, %v181_v5  ;;  %v186_v10 = vsel %vm180_vm1, %v151_v4, 0.0  ;;  %v188_v13 = vsel %vm180_vm1, %v152_v8, 0.0  ;;  %v154_v14 = vld [vmem:[%s415_s13 + $0x30] sm:$0xff]  ;;  %v190_v16 = vsel %vm180_vm1, %v153_v11, 0.0  ;;  %v155_v17 = vld [vmem:[%s415_s13 + $0x38] sm:$0xff]  ;;  %v156_v20 = vld [vmem:[%s415_s13 + $0x40] sm:$0xff] }
  0x12   : > { %v192_v19 = vsel %vm180_vm1, %v154_v14, 0.0  ;;  %v194_v22 = vsel %vm180_vm1, %v155_v17, 0.0  ;;  %v157_v23 = vld [vmem:[%s415_s13 + $0x48] sm:$0xff]  ;;  %v196_v25 = vsel %vm180_vm1, %v156_v20, 0.0  ;;  %v158_v26 = vld [vmem:[%s415_s13 + $0x50] sm:$0xff]  ;;  %v159_v29 = vld [vmem:[%s415_s13 + $0x58] sm:$0xff] }
  0x13   : > { %v185_v12 = vadd.f32 %v184_v7, %v183_v9  ;;  %v198_v28 = vsel %vm180_vm1, %v157_v23, 0.0  ;;  %v200_v31 = vsel %vm180_vm1, %v158_v26, 0.0  ;;  %v160_v32 = vld [vmem:[%s415_s13 + $0x60] sm:$0xff]  ;;  %v202_v34 = vsel %vm180_vm1, %v159_v29, 0.0  ;;  %v161_v35 = vld [vmem:[%s415_s13 + $0x68] sm:$0xff]  ;;  %v162_v38 = vld [vmem:[%s415_s13 + $0x70] sm:$0xff] }
  0x14   : > { %v204_v37 = vsel %vm180_vm1, %v160_v32, 0.0  ;;  %v206_v40 = vsel %vm180_vm1, %v161_v35, 0.0  ;;  %v163_v41 = vld [vmem:[%s415_s13 + $0x78] sm:$0xff]  ;;  %v208_v43 = vsel %vm180_vm1, %v162_v38, 0.0  ;;  %v164_v44 = vld [vmem:[%s415_s13 + $0x80] sm:$0xff]  ;;  %v165_v47 = vld [vmem:[%s415_s13 + $0x88] sm:$0xff] }
  0x15   : > { %v187_v15 = vadd.f32 %v186_v10, %v185_v12  ;;  %v210_v46 = vsel %vm180_vm1, %v163_v41, 0.0  ;;  %v212_v49 = vsel %vm180_vm1, %v164_v44, 0.0  ;;  %v166_v50 = vld [vmem:[%s415_s13 + $0x90] sm:$0xff]  ;;  %v214_v52 = vsel %vm180_vm1, %v165_v47, 0.0  ;;  %v167_v53 = vld [vmem:[%s415_s13 + $0x98] sm:$0xff]  ;;  %v168_v56 = vld [vmem:[%s415_s13 + $0xa0] sm:$0xff] }
  0x16   : > { %v216_v55 = vsel %vm180_vm1, %v166_v50, 0.0  ;;  %v218_v58 = vsel %vm180_vm1, %v167_v53, 0.0  ;;  %v169_v59 = vld [vmem:[%s415_s13 + $0xa8] sm:$0xff]  ;;  %v220_v61 = vsel %vm180_vm1, %v168_v56, 0.0  ;;  %v170_v62 = vld [vmem:[%s415_s13 + $0xb0] sm:$0xff]  ;;  %v171_v1 = vld [vmem:[%s415_s13 + $0xb8] sm:$0xff] }
  0x17   : > { %v189_v18 = vadd.f32 %v188_v13, %v187_v15  ;;  %v222_v0 = vsel %vm180_vm1, %v169_v59, 0.0  ;;  %v224_v3 = vsel %vm180_vm1, %v170_v62, 0.0  ;;  %v172_v4 = vld [vmem:[%s415_s13 + $0xc0] sm:$0xff]  ;;  %v226_v6 = vsel %vm180_vm1, %v171_v1, 0.0  ;;  %v173_v7 = vld [vmem:[%s415_s13 + $0xc8] sm:$0xff]  ;;  %v174_v10 = vld [vmem:[%s415_s13 + $0xd0] sm:$0xff] }
  0x18   : > { %v228_v9 = vsel %vm180_vm1, %v172_v4, 0.0  ;;  %v230_v12 = vsel %vm180_vm1, %v173_v7, 0.0  ;;  %v175_v13 = vld [vmem:[%s415_s13 + $0xd8] sm:$0xff]  ;;  %v232_v15 = vsel %vm180_vm1, %v174_v10, 0.0 }
  0x19   : > { %v191_v21 = vadd.f32 %v190_v16, %v189_v18  ;;  %v176_v16 = vld [vmem:[%s415_s13 + $0xe0] sm:$0xff]  ;;  %v234_v18 = vsel %vm180_vm1, %v175_v13, 0.0 }
  0x1b   : > { %v193_v24 = vadd.f32 %v192_v19, %v191_v21  ;;  %v177_v19 = vld [vmem:[%s415_s13 + $0xe8] sm:$0xff]  ;;  %v236_v21 = vsel %vm180_vm1, %v176_v16, 0.0 }
  0x1d   : > { %v195_v27 = vadd.f32 %v194_v22, %v193_v24  ;;  %v178_v22 = vld [vmem:[%s415_s13 + $0xf0] sm:$0xff]  ;;  %v238_v24 = vsel %vm180_vm1, %v177_v19, 0.0 }
  0x1f   : > { %v197_v30 = vadd.f32 %v196_v25, %v195_v27  ;;  %v179_v25 = vld [vmem:[%s415_s13 + $0xf8] sm:$0xff]  ;;  %v240_v27 = vsel %vm180_vm1, %v178_v22, 0.0 }
  0x20   : > { %v242_v29 = vsel %vm180_vm1, %v179_v25, 0.0 }
  0x21   : > { %v199_v33 = vadd.f32 %v198_v28, %v197_v30 }
  0x23   : > { %v201_v36 = vadd.f32 %v200_v31, %v199_v33 }
  0x25   : > { %v203_v39 = vadd.f32 %v202_v34, %v201_v36 }
  0x27   : > { %v205_v42 = vadd.f32 %v204_v37, %v203_v39  ;;  %v147_v37 = vld [vmem:[#allocation2] sm:$0x1] }
  0x29   : > { %v207_v45 = vadd.f32 %v206_v40, %v205_v42 }
  0x2b   : > { %v209_v48 = vadd.f32 %v208_v43, %v207_v45 }
  0x2d   : > { %v211_v51 = vadd.f32 %v210_v46, %v209_v48 }
  0x2f   : > { %v213_v54 = vadd.f32 %v212_v49, %v211_v51 }
  0x31   : > { %v215_v57 = vadd.f32 %v214_v52, %v213_v54 }
  0x33   : > { %v217_v60 = vadd.f32 %v216_v55, %v215_v57 }
  0x35   : > { %v219_v63 = vadd.f32 %v218_v58, %v217_v60 }
  0x37   : > { %v221_v2 = vadd.f32 %v220_v61, %v219_v63 }
  0x39   : > { %v223_v5 = vadd.f32 %v222_v0, %v221_v2 }
  0x3b   : > { %v225_v8 = vadd.f32 %v224_v3, %v223_v5 }
  0x3d   : > { %v227_v11 = vadd.f32 %v226_v6, %v225_v8 }
  0x3f   : > { %v229_v14 = vadd.f32 %v228_v9, %v227_v11 }
  0x41   : > { %v231_v17 = vadd.f32 %v230_v12, %v229_v14 }
  0x43   : > { %v233_v20 = vadd.f32 %v232_v15, %v231_v17 }
  0x45   : > { %v235_v23 = vadd.f32 %v234_v18, %v233_v20 }
  0x47   : > { %v237_v26 = vadd.f32 %v236_v21, %v235_v23 }
  0x49   : > { %v239_v28 = vadd.f32 %v238_v24, %v237_v26 }
  0x4b   : > { %v241_v30 = vadd.f32 %v240_v27, %v239_v28 }
  0x4d   : > { %v243_v31 = vadd.f32 %v242_v29, %v241_v30 }
  0x4f   : > { %v244_v32 = vrot.slane %v243_v31, 4 }
  0x51   : > { %v245_v33 = vadd.f32 %v244_v32, %v243_v31 }
  0x53   : > { %v246_v34 = vrot.slane %v245_v33, 2 }
  0x55   : > { %v247_v35 = vadd.f32 %v246_v34, %v245_v33 }
  0x57   : > { %v248_v36 = vrot.slane %v247_v35, 1 }
  0x59   : > { %v249_v38 = vadd.f32 %v248_v36, %v247_v35 }
  0x5b   : > { %v250_v39 = vadd.f32 %v249_v38, %v147_v37 }
  0x5d   : > { %252 = vst.msk [vmem:[#allocation2] sm:$0x1] %vm145_vm0, %v250_v39 }
  0x64   : > { %v256_v40 = vld [vmem:[#allocation2] sm:$0x1] }
  0x65   : > { %v257_v41 = vmul.f32 0.00390625, %v256_v40 }
  0x67   : > { %258 = vst.msk [vmem:[%s140_s16] sm:$0x1] %vm145_vm0, %v257_v41 }
  0x68 PF: > { %s11_s8 = sadd.s32 1, %s377_s8   ;;  %s498_s6 = smov %s373_s7 }
  0x69   : > { %p8_p5 = scmp.ge.s32.totalorder %s11_s8, 4   ;;  %s499_s7 = smov %s501_s9 }
  0x6b   :  { %10 = sbr.rel (!%p8_p5) target bundleno = 2 (0x2), region = 62 }

// kernel: ccc_forward.7
= control target key start
LH: loop header
LB: loop body
LE: loop exit
PB: predicated region body
PF: predicated region fallthrough
CT: control target
= control target key end

     0   :  { %8 = vsyncpa [#allocation3], 0  ;;  %s1357_s0 = inlined_call_operand.vmem [shape: f32[2,256,32], index: 0, kind: input, shape index: {}]   ;;  %s1358_s1 = inlined_call_operand.vmem [shape: f32[32,32], index: 1, kind: input, shape index: {}]   ;;  %s1359_s2 = inlined_call_operand.vmem [shape: f32[2,1,32], index: 2, kind: input, shape index: {}]   ;;  %s1360_s3 = inlined_call_operand.hbm [shape: f32[2,256,32], index: 3, kind: output, shape index: {}]  }
   0x1   :  { %10 = vsyncpa [#allocation3 + $0x1], 0  ;;  %s1053_s12 = smov 0   ;;  %s1055_s13 = smov 0  }
   0x2   :  { %s1057_s14 = smov 0   ;;  %s1059_s15 = smov 0  }
   0x3   :  { %s1061_s16 = smov 0   ;;  %s1063_s17 = smov 0  }
   0x4 LB: > { %s747_s18 = sadd.s32 4294967295, %s1028_s17   ;;  %s748_s19 = sadd.s32 4294967294, %s1028_s17   ;;  %s1028_s17 = sphi %s1063_s17, %s16_s17   ;;  %s1024_s16 = sphi %s1061_s16, %s1367_s16   ;;  %s1020_s15 = sphi %s1059_s15, %s1366_s15   ;;  %s1016_s14 = sphi %s1057_s14, %s1365_s14   ;;  %s1012_s13 = sphi %s1055_s13, %s1364_s13   ;;  %s1008_s12 = sphi %s1053_s12, %s1363_s12  }
   0x5   : > { %s28_s20 = sadd.s32 1, %s1024_s16  ;;  %s112_s21 = sadd.s32 1, %s1016_s14 }
   0x6   : > { %p30_p0 = scmp.ge.s32.totalorder %s28_s20, 2  ;;  %p122_p1 = scmp.ne.s32.totalorder %s1016_s14, %s1012_s13 }
   0x7   : > { %p123_p2 = scmp.eq.s32.totalorder %s747_s18, 1  ;;  %p128_p3 = scmp.ne.s32.totalorder %s1012_s13, %s1008_s12 }
   0x8   : > { %s1369_s20 = smov (%p30_p0, %s28_s20), 0  ;;  %p129_p5 = scmp.eq.s32.totalorder %s748_s19, 1 }
   0x9   : > { %p1093_p4 = por %p123_p2, %p122_p1  ;;  %s107_s23 = ssub.s32 %s1024_s16, %s1369_s20 }
   0xa   : > { %p751_p6 = scmp.ge.s32.totalorder %s1028_s17, 1  ;;  %p110_p7 = scmp.eq.s32.totalorder %s107_s23, 0 }
   0xb   : > { %p1100_p8 = por %p129_p5, %p128_p3  ;;  %p169_p9 = scmp.lt.s32.totalorder %s1028_s17, 3 }
   0xc   : > { %s1106_s25 = scalar_select %p110_p7, %s1016_s14, %s112_s21  }
   0xd   : > { %p170_p10 = pnand %p751_p6, %p169_p9 }
   0xe   : > { %p201_p11 = scmp.lt.s32.totalorder (!%p170_p10), %s1020_s15, 1  ;;  %s197_s23 = sand.u32 (!%p170_p10), 1, %s1012_s13  }
   0xf   : > { %173 = sbr.rel (%p170_p10) target bundleno = 271 (0x10f), region = 32  ;;  %s752_s26 = sshll.u32 (!%p170_p10), %s197_s23, 8 }
  0x10   : > { %s1207_s27 = scalar_lea.vmem (!%p170_p10), [#allocation2], %s752_s26  ;;  %s794_s28 = sshll.u32 (!%p170_p10), %s1020_s15, 12 }
  0x11   : > { %s659_s29 = sshll.u32 (!%p170_p10), %s1207_s27, 4  ;;  %s1030_s7 = smov (!%p170_p10), [#allocation2]   ;;  %s1300_s29 = int_to_ptr.vmem [resolvable:$true] %s659_s29 }
  0x12   : > { %s952_s6 = scalar_lea.vmem (!%p170_p10), %s1300_s29, 4096 }
  0x13   : > { %p953_p12 = scmp.ne.s32.totalorder (!%p170_p10), %s1300_s29, %s952_s6 }
  0x14   : > { %v249_v0 = vld [vmem:[%s1358_s1 + $0x18] sm:$0xff]  ;;  %v248_v1 = vld [vmem:[%s1358_s1 + $0x10] sm:$0xff]  ;;  %v247_v2 = vld [vmem:[%s1358_s1 + $0x8] sm:$0xff]  ;;  %s1119_s5 = scalar_select %p201_p11, %s1020_s15, 1  ;;  %vm257_vm0 = vcmask 261120  }
  0x15   : > { %831 = vmatprep.subr.mxu0 %v249_v0  ;;  %887 = vmatprep.subr.mxu1 %v249_v0  ;;  %v246_v3 = vld [vmem:[%s1358_s1] sm:$0xff]  ;;  %s1298_s15 = scalar_lea.hbm %s1360_s3, %s794_s28  ;;  %p954_p13 = pnand %p953_p12, %p1093_p4 }
  0x16   : > { %832 = vmatpush3.msra.mxu0 %v249_v0  ;;  %891 = vmatpush3.msra.mxu1 %v249_v0  ;;  %s793_s8 = sshll.u32 %s1119_s5, 8  ;;  %s212_s21 = scalar_lea.vmem %s1359_s2, %s1119_s5 }
  0x17   : > { %833 = vmatprep.subr.mxu0 %v248_v1  ;;  %888 = vmatprep.subr.mxu1 %v248_v1  ;;  %s1128_s11 = scalar_lea.vmem %s1357_s0, %s793_s8  ;;  %v1199_v36 = vld [vmem:[%s212_s21] ss:$0 sm:$0xff]  ;;  %s1312_s5 = scalar_lea.sflag [#allocation3], %s197_s23 }
  0x18   : > { %834 = vmatpush3.msra.mxu0 %v248_v1  ;;  %892 = vmatpush3.msra.mxu1 %v248_v1  ;;  %v214_v4 = vld [vmem:[%s1128_s11] sm:$0xff]  ;;  %v215_v6 = vld [vmem:[%s1128_s11 + $0x8] sm:$0xff]  ;;  %v216_v8 = vld [vmem:[%s1128_s11 + $0x10] sm:$0xff]  ;;  %p955_p0 = pneg %p954_p13  ;;  %s956_s8 = sshll.u32 %s1030_s7, 4  ;;  %s957_s8 = int_to_ptr.vmem [resolvable:$false] %s956_s8 }
  0x19   : > { %835 = vmatprep.subr.mxu0 %v247_v2  ;;  %889 = vmatprep.subr.mxu1 %v247_v2  ;;  %v230_v5 = vld [vmem:[%s1128_s11 + $0x80] sm:$0xff]  ;;  %v231_v7 = vld [vmem:[%s1128_s11 + $0x88] sm:$0xff]  ;;  %v232_v9 = vld [vmem:[%s1128_s11 + $0x90] sm:$0xff]  ;;  %s958_s9 = scalar_lea.vmem %s957_s8, 8192  ;;  %p959_p1 = scmp.lt.s32.totalorder %s1300_s29, %s957_s8 }
  0x1a   : > { %836 = vmatpush3.msra.mxu0 %v247_v2  ;;  %893 = vmatpush3.msra.mxu1 %v247_v2  ;;  %v217_v10 = vld [vmem:[%s1128_s11 + $0x18] sm:$0xff]  ;;  %v218_v12 = vld [vmem:[%s1128_s11 + $0x20] sm:$0xff]  ;;  %v219_v14 = vld [vmem:[%s1128_s11 + $0x28] sm:$0xff]  ;;  %p960_p2 = scmp.lt.s32.totalorder %s958_s9, %s952_s6 }
  0x1b   : > { %837 = vmatprep.subr.mxu0 %v246_v3  ;;  %890 = vmatprep.subr.mxu1 %v246_v3  ;;  %v233_v11 = vld [vmem:[%s1128_s11 + $0x98] sm:$0xff]  ;;  %v234_v13 = vld [vmem:[%s1128_s11 + $0xa0] sm:$0xff]  ;;  %v235_v15 = vld [vmem:[%s1128_s11 + $0xa8] sm:$0xff] }
  0x1c   : > { %838 = vmatpush3.msra.mxu0 %v246_v3  ;;  %894 = vmatpush3.msra.mxu1 %v246_v3  ;;  %v220_v16 = vld [vmem:[%s1128_s11 + $0x30] sm:$0xff]  ;;  %v221_v18 = vld [vmem:[%s1128_s11 + $0x38] sm:$0xff]  ;;  %v222_v20 = vld [vmem:[%s1128_s11 + $0x40] sm:$0xff]  ;;  %p961_p3 = por %p960_p2, %p959_p1 }
  0x1d   : > { %839 = vmatprep.mubr.msk.f32.mxu0 %vm257_vm0, %v214_v4  ;;  %863 = vmatprep.mubr.msk.f32.mxu1 %vm257_vm0, %v230_v5  ;;  %v236_v17 = vld [vmem:[%s1128_s11 + $0xb0] sm:$0xff]  ;;  %v237_v19 = vld [vmem:[%s1128_s11 + $0xb8] sm:$0xff]  ;;  %v238_v21 = vld [vmem:[%s1128_s11 + $0xc0] sm:$0xff] }
  0x1e   : > { %840 = vmatmul.mubr.msk.f32.vlgmr.msra.gmra.mxu0 %vm257_vm0, %v215_v6  ;;  %864 = vmatmul.mubr.msk.f32.vlgmr.msra.gmra.mxu1 %vm257_vm0, %v231_v7  ;;  %v223_v22 = vld [vmem:[%s1128_s11 + $0x48] sm:$0xff]  ;;  %v224_v24 = vld [vmem:[%s1128_s11 + $0x50] sm:$0xff]  ;;  %v225_v26 = vld [vmem:[%s1128_s11 + $0x58] sm:$0xff]  ;;  %p962_p5 = pnand %p961_p3, %p955_p0 }
  0x1f   : > { %842 = vmatprep.mubr.msk.f32.mxu0 %vm257_vm0, %v216_v8  ;;  %866 = vmatprep.mubr.msk.f32.mxu1 %vm257_vm0, %v232_v9  ;;  %v239_v23 = vld [vmem:[%s1128_s11 + $0xc8] sm:$0xff]  ;;  %v240_v25 = vld [vmem:[%s1128_s11 + $0xd0] sm:$0xff]  ;;  %v241_v27 = vld [vmem:[%s1128_s11 + $0xd8] sm:$0xff] }
  0x20   : > { %v226_v28 = vld [vmem:[%s1128_s11 + $0x60] sm:$0xff]  ;;  %v227_v30 = vld [vmem:[%s1128_s11 + $0x68] sm:$0xff]  ;;  %v228_v32 = vld [vmem:[%s1128_s11 + $0x70] sm:$0xff] }
  0x21   : > { %v242_v29 = vld [vmem:[%s1128_s11 + $0xe0] sm:$0xff]  ;;  %v243_v31 = vld [vmem:[%s1128_s11 + $0xe8] sm:$0xff]  ;;  %v244_v33 = vld [vmem:[%s1128_s11 + $0xf0] sm:$0xff] }
  0x22   : > { %843 = vmatmul.mubr.msk.f32.gmra.mxu0 %vm257_vm0, %v217_v10  ;;  %867 = vmatmul.mubr.msk.f32.gmra.mxu1 %vm257_vm0, %v233_v11  ;;  %v229_v34 = vld [vmem:[%s1128_s11 + $0x78] sm:$0xff] }
  0x23   : > { %845 = vmatprep.mubr.msk.f32.mxu0 %vm257_vm0, %v218_v12  ;;  %869 = vmatprep.mubr.msk.f32.mxu1 %vm257_vm0, %v234_v13  ;;  %v245_v35 = vld [vmem:[%s1128_s11 + $0xf8] sm:$0xff] }
  0x26   : > { %846 = vmatmul.mubr.msk.f32.gmra.mxu0 %vm257_vm0, %v219_v14  ;;  %870 = vmatmul.mubr.msk.f32.gmra.mxu1 %vm257_vm0, %v235_v15 }
  0x27   : > { %848 = vmatprep.mubr.msk.f32.mxu0 %vm257_vm0, %v220_v16  ;;  %872 = vmatprep.mubr.msk.f32.mxu1 %vm257_vm0, %v236_v17 }
  0x2a   : > { %849 = vmatmul.mubr.msk.f32.gmra.mxu0 %vm257_vm0, %v221_v18  ;;  %873 = vmatmul.mubr.msk.f32.gmra.mxu1 %vm257_vm0, %v237_v19 }
  0x2b   : > { %851 = vmatprep.mubr.msk.f32.mxu0 %vm257_vm0, %v222_v20  ;;  %875 = vmatprep.mubr.msk.f32.mxu1 %vm257_vm0, %v238_v21 }
  0x2e   : > { %852 = vmatmul.mubr.msk.f32.gmra.mxu0 %vm257_vm0, %v223_v22  ;;  %876 = vmatmul.mubr.msk.f32.gmra.mxu1 %vm257_vm0, %v239_v23 }
  0x2f   : > { %854 = vmatprep.mubr.msk.f32.mxu0 %vm257_vm0, %v224_v24  ;;  %878 = vmatprep.mubr.msk.f32.mxu1 %vm257_vm0, %v240_v25 }
  0x32   : > { %855 = vmatmul.mubr.msk.f32.gmra.mxu0 %vm257_vm0, %v225_v26  ;;  %879 = vmatmul.mubr.msk.f32.gmra.mxu1 %vm257_vm0, %v241_v27 }
  0x33   : > { %857 = vmatprep.mubr.msk.f32.mxu0 %vm257_vm0, %v226_v28  ;;  %881 = vmatprep.mubr.msk.f32.mxu1 %vm257_vm0, %v242_v29 }
  0x36   : > { %858 = vmatmul.mubr.msk.f32.gmra.mxu0 %vm257_vm0, %v227_v30  ;;  %882 = vmatmul.mubr.msk.f32.gmra.mxu1 %vm257_vm0, %v243_v31 }
  0x37   : > { %860 = vmatprep.mubr.msk.f32.mxu0 %vm257_vm0, %v228_v32  ;;  %884 = vmatprep.mubr.msk.f32.mxu1 %vm257_vm0, %v244_v33 }
  0x3a   : > { %861 = vmatmul.mubr.msk.f32.gmra.mxu0 %vm257_vm0, %v229_v34  ;;  %885 = vmatmul.mubr.msk.f32.gmra.mxu1 %vm257_vm0, %v245_v35 }
  0xde   : > { %v841_v37 = vpop.f32.mrf.mxu0  ;;  %v865_v38 = vpop.f32.mrf.mxu1 }
  0xdf   : > { %v426_v39 = vadd.f32 %v841_v37, %v1199_v36  ;;  %v506_v40 = vadd.f32 %v865_v38, %v1199_v36 }
  0xe0   : > { %v420_v41 = vpop.f32.mrf.mxu0  ;;  %v500_v42 = vpop.f32.mrf.mxu1 }
  0xe1   : > { %v580_v43 = vmax.f32 %v426_v39, 0.0  ;;  %v596_v44 = vmax.f32 %v506_v40, 0.0  ;;  %v421_v45 = vadd.f32 %v1199_v36, %v420_v41  ;;  %v501_v46 = vadd.f32 %v1199_v36, %v500_v42 }
  0xe2   : > { %v844_v47 = vpop.f32.mrf.mxu0  ;;  %v868_v48 = vpop.f32.mrf.mxu1 }
  0xe3   : > { %612 = vst.msk [vmem:[%s1207_s27 + $0x8] sm:$0xff] %vm257_vm0, %v580_v43  ;;  %628 = vst.msk [vmem:[%s1207_s27 + $0x88] sm:$0xff] %vm257_vm0, %v596_v44  ;;  %v579_v49 = vmax.f32 %v421_v45, 0.0  ;;  %v595_v50 = vmax.f32 %v501_v46, 0.0  ;;  %v436_v51 = vadd.f32 %v844_v47, %v1199_v36  ;;  %v516_v52 = vadd.f32 %v868_v48, %v1199_v36 }
  0xe4   : > { %v430_v53 = vpop.f32.mrf.mxu0  ;;  %v510_v54 = vpop.f32.mrf.mxu1 }
  0xe5   : > { %611 = vst.msk [vmem:[%s1207_s27] sm:$0xff] %vm257_vm0, %v579_v49  ;;  %627 = vst.msk [vmem:[%s1207_s27 + $0x80] sm:$0xff] %vm257_vm0, %v595_v50  ;;  %v582_v55 = vmax.f32 %v436_v51, 0.0  ;;  %v598_v56 = vmax.f32 %v516_v52, 0.0  ;;  %v431_v57 = vadd.f32 %v1199_v36, %v430_v53  ;;  %v511_v58 = vadd.f32 %v1199_v36, %v510_v54 }
  0xe6   : > { %v847_v59 = vpop.f32.mrf.mxu0  ;;  %v871_v60 = vpop.f32.mrf.mxu1 }
  0xe7   : > { %614 = vst.msk [vmem:[%s1207_s27 + $0x18] sm:$0xff] %vm257_vm0, %v582_v55  ;;  %630 = vst.msk [vmem:[%s1207_s27 + $0x98] sm:$0xff] %vm257_vm0, %v598_v56  ;;  %v581_v61 = vmax.f32 %v431_v57, 0.0  ;;  %v597_v62 = vmax.f32 %v511_v58, 0.0  ;;  %v446_v63 = vadd.f32 %v847_v59, %v1199_v36  ;;  %v526_v0 = vadd.f32 %v871_v60, %v1199_v36 }
  0xe8   : > { %v440_v1 = vpop.f32.mrf.mxu0  ;;  %v520_v2 = vpop.f32.mrf.mxu1 }
  0xe9   : > { %613 = vst.msk [vmem:[%s1207_s27 + $0x10] sm:$0xff] %vm257_vm0, %v581_v61  ;;  %629 = vst.msk [vmem:[%s1207_s27 + $0x90] sm:$0xff] %vm257_vm0, %v597_v62  ;;  %v584_v3 = vmax.f32 %v446_v63, 0.0  ;;  %v600_v4 = vmax.f32 %v526_v0, 0.0  ;;  %v441_v5 = vadd.f32 %v1199_v36, %v440_v1  ;;  %v521_v6 = vadd.f32 %v1199_v36, %v520_v2 }
  0xea   : > { %v850_v7 = vpop.f32.mrf.mxu0  ;;  %v874_v8 = vpop.f32.mrf.mxu1 }
  0xeb   : > { %616 = vst.msk [vmem:[%s1207_s27 + $0x28] sm:$0xff] %vm257_vm0, %v584_v3  ;;  %632 = vst.msk [vmem:[%s1207_s27 + $0xa8] sm:$0xff] %vm257_vm0, %v600_v4  ;;  %v583_v9 = vmax.f32 %v441_v5, 0.0  ;;  %v599_v10 = vmax.f32 %v521_v6, 0.0  ;;  %v456_v11 = vadd.f32 %v850_v7, %v1199_v36  ;;  %v536_v12 = vadd.f32 %v874_v8, %v1199_v36 }
  0xec   : > { %v450_v13 = vpop.f32.mrf.mxu0  ;;  %v530_v14 = vpop.f32.mrf.mxu1 }
  0xed   : > { %615 = vst.msk [vmem:[%s1207_s27 + $0x20] sm:$0xff] %vm257_vm0, %v583_v9  ;;  %631 = vst.msk [vmem:[%s1207_s27 + $0xa0] sm:$0xff] %vm257_vm0, %v599_v10  ;;  %v586_v15 = vmax.f32 %v456_v11, 0.0  ;;  %v602_v16 = vmax.f32 %v536_v12, 0.0  ;;  %v451_v17 = vadd.f32 %v1199_v36, %v450_v13  ;;  %v531_v18 = vadd.f32 %v1199_v36, %v530_v14 }
  0xee   : > { %v853_v19 = vpop.f32.mrf.mxu0  ;;  %v877_v20 = vpop.f32.mrf.mxu1 }
  0xef   : > { %618 = vst.msk [vmem:[%s1207_s27 + $0x38] sm:$0xff] %vm257_vm0, %v586_v15  ;;  %634 = vst.msk [vmem:[%s1207_s27 + $0xb8] sm:$0xff] %vm257_vm0, %v602_v16  ;;  %v585_v21 = vmax.f32 %v451_v17, 0.0  ;;  %v601_v22 = vmax.f32 %v531_v18, 0.0  ;;  %v466_v23 = vadd.f32 %v853_v19, %v1199_v36  ;;  %v546_v24 = vadd.f32 %v877_v20, %v1199_v36 }
  0xf0   : > { %v460_v25 = vpop.f32.mrf.mxu0  ;;  %v540_v26 = vpop.f32.mrf.mxu1 }
  0xf1   : > { %617 = vst.msk [vmem:[%s1207_s27 + $0x30] sm:$0xff] %vm257_vm0, %v585_v21  ;;  %633 = vst.msk [vmem:[%s1207_s27 + $0xb0] sm:$0xff] %vm257_vm0, %v601_v22  ;;  %v588_v27 = vmax.f32 %v466_v23, 0.0  ;;  %v604_v28 = vmax.f32 %v546_v24, 0.0  ;;  %v461_v29 = vadd.f32 %v1199_v36, %v460_v25  ;;  %v541_v30 = vadd.f32 %v1199_v36, %v540_v26 }
  0xf2   : > { %v856_v31 = vpop.f32.mrf.mxu0  ;;  %v880_v32 = vpop.f32.mrf.mxu1 }
  0xf3   : > { %620 = vst.msk [vmem:[%s1207_s27 + $0x48] sm:$0xff] %vm257_vm0, %v588_v27  ;;  %636 = vst.msk [vmem:[%s1207_s27 + $0xc8] sm:$0xff] %vm257_vm0, %v604_v28  ;;  %v587_v33 = vmax.f32 %v461_v29, 0.0  ;;  %v603_v34 = vmax.f32 %v541_v30, 0.0  ;;  %v476_v35 = vadd.f32 %v856_v31, %v1199_v36  ;;  %v556_v37 = vadd.f32 %v880_v32, %v1199_v36 }
  0xf4   : > { %v470_v38 = vpop.f32.mrf.mxu0  ;;  %v550_v39 = vpop.f32.mrf.mxu1 }
  0xf5   : > { %619 = vst.msk [vmem:[%s1207_s27 + $0x40] sm:$0xff] %vm257_vm0, %v587_v33  ;;  %635 = vst.msk [vmem:[%s1207_s27 + $0xc0] sm:$0xff] %vm257_vm0, %v603_v34  ;;  %v590_v40 = vmax.f32 %v476_v35, 0.0  ;;  %v606_v41 = vmax.f32 %v556_v37, 0.0  ;;  %v471_v42 = vadd.f32 %v1199_v36, %v470_v38  ;;  %v551_v43 = vadd.f32 %v1199_v36, %v550_v39 }
  0xf6   : > { %v859_v44 = vpop.f32.mrf.mxu0  ;;  %v883_v45 = vpop.f32.mrf.mxu1 }
  0xf7   : > { %622 = vst.msk [vmem:[%s1207_s27 + $0x58] sm:$0xff] %vm257_vm0, %v590_v40  ;;  %638 = vst.msk [vmem:[%s1207_s27 + $0xd8] sm:$0xff] %vm257_vm0, %v606_v41  ;;  %v589_v46 = vmax.f32 %v471_v42, 0.0  ;;  %v605_v47 = vmax.f32 %v551_v43, 0.0  ;;  %v486_v48 = vadd.f32 %v859_v44, %v1199_v36  ;;  %v566_v49 = vadd.f32 %v883_v45, %v1199_v36 }
  0xf8   : > { %v480_v50 = vpop.f32.mrf.mxu0  ;;  %v560_v51 = vpop.f32.mrf.mxu1 }
  0xf9   : > { %621 = vst.msk [vmem:[%s1207_s27 + $0x50] sm:$0xff] %vm257_vm0, %v589_v46  ;;  %637 = vst.msk [vmem:[%s1207_s27 + $0xd0] sm:$0xff] %vm257_vm0, %v605_v47  ;;  %v592_v52 = vmax.f32 %v486_v48, 0.0  ;;  %v608_v53 = vmax.f32 %v566_v49, 0.0  ;;  %v481_v54 = vadd.f32 %v1199_v36, %v480_v50  ;;  %v561_v55 = vadd.f32 %v1199_v36, %v560_v51 }
  0xfa   : > { %v862_v56 = vpop.f32.mrf.mxu0  ;;  %v886_v57 = vpop.f32.mrf.mxu1 }
  0xfb   : > { %624 = vst.msk [vmem:[%s1207_s27 + $0x68] sm:$0xff] %vm257_vm0, %v592_v52  ;;  %640 = vst.msk [vmem:[%s1207_s27 + $0xe8] sm:$0xff] %vm257_vm0, %v608_v53  ;;  %v591_v58 = vmax.f32 %v481_v54, 0.0  ;;  %v607_v59 = vmax.f32 %v561_v55, 0.0  ;;  %v496_v60 = vadd.f32 %v862_v56, %v1199_v36  ;;  %v576_v61 = vadd.f32 %v886_v57, %v1199_v36 }
  0xfc   : > { %v490_v62 = vpop.f32.mrf.mxu0  ;;  %v570_v63 = vpop.f32.mrf.mxu1 }
  0xfd   : > { %623 = vst.msk [vmem:[%s1207_s27 + $0x60] sm:$0xff] %vm257_vm0, %v591_v58  ;;  %639 = vst.msk [vmem:[%s1207_s27 + $0xe0] sm:$0xff] %vm257_vm0, %v607_v59  ;;  %v594_v0 = vmax.f32 %v496_v60, 0.0  ;;  %v610_v1 = vmax.f32 %v576_v61, 0.0  ;;  %v491_v2 = vadd.f32 %v1199_v36, %v490_v62  ;;  %v571_v3 = vadd.f32 %v1199_v36, %v570_v63 }
  0xff   : > { %626 = vst.msk [vmem:[%s1207_s27 + $0x78] sm:$0xff] %vm257_vm0, %v594_v0  ;;  %642 = vst.msk [vmem:[%s1207_s27 + $0xf8] sm:$0xff] %vm257_vm0, %v610_v1  ;;  %v593_v4 = vmax.f32 %v491_v2, 0.0  ;;  %v609_v5 = vmax.f32 %v571_v3, 0.0 }
 0x101   : > { %625 = vst.msk [vmem:[%s1207_s27 + $0x70] sm:$0xff] %vm257_vm0, %v593_v4  ;;  %641 = vst.msk [vmem:[%s1207_s27 + $0xf0] sm:$0xff] %vm257_vm0, %v609_v5 }
 0x102   : > { %965 = shalt.err (!%p962_p5)
}
 0x103   : > { %s966_s10 = scalar_lea.hbm %s1298_s15, 4096  ;;  %s970_s19 = scalar_lea.hbm %s1360_s3, 8192 }
 0x104   : > { %p967_p6 = scmp.ne.s32.totalorder %s1298_s15, %s966_s10  ;;  %p971_p10 = scmp.lt.s32.totalorder %s1298_s15, %s1360_s3 }
 0x105   : > { %p972_p11 = scmp.lt.s32.totalorder %s970_s19, %s966_s10 }
 0x106   : > { %p968_p7 = pnand %p967_p6, %p1093_p4 }
 0x107   : > { %p973_p12 = por %p972_p11, %p971_p10 }
 0x108   : > { %p969_p9 = pneg %p968_p7 }
 0x10a   : > { %p974_p13 = pnand %p973_p12, %p969_p9 }
 0x10c   : > { %977 = shalt.err (!%p974_p13)
}
 0x10d   : > { %s1031_s26 = smov 128   ;;  %s1032_s27 = smov 8  }
 0x10e   : > { %895 = dma.vmem_to_hbm [thread:$0]  (%p1093_p4), %s1300_s29, 4096, %s1298_s15, %s1312_s5, %s1031_s26, %s1031_s26, %s1032_s27  }
 0x10f PF: > { %p901_p0 = scmp.ge.s32.totalorder %s1028_s17, 2  ;;  %s674_s28 = sand.u32 1, %s1008_s12  }
 0x110   : > { %s675_s30 = scalar_lea.sflag [#allocation3], %s674_s28 }
 0x111   : > { %p898_p1 = pnand %p901_p0, %p1100_p8 }
 0x113   : > { %p899_p2 = pneg %p898_p1 }
 0x115   : > { %1003 = dma.done.wait (%p899_p2), %s675_s30, 4096  }
 0x116   : > { %1005 = vsyncadd (%p899_p2), %s675_s30, 4294963200  ;;  %s16_s17 = sadd.s32 1, %s1028_s17   ;;  %s1363_s12 = smov %s1012_s13 }
 0x117   : > { %p13_p3 = scmp.ge.s32.totalorder %s16_s17, 4   ;;  %s1364_s13 = smov %s1016_s14 }
 0x118   : > { %s1365_s14 = smov %s1106_s25  ;;  %s1366_s15 = smov %s1024_s16 }
 0x119   : > { %s1367_s16 = smov %s1369_s20  ;;  %15 = sbr.rel (!%p13_p3) target bundleno = 4 (0x4), region = 70 }
 0x11e   :  { %680 = vsyncpa [#allocation3], 1 }
 0x11f   :  { %682 = vsyncpa [#allocation3 + $0x1], 1 }

// kernel: ccc_forward.6
= control target key start
LH: loop header
LB: loop body
LE: loop exit
PB: predicated region body
PF: predicated region fallthrough
CT: control target
= control target key end

     0   :  { %v539_v0 = vmov 0.0   ;;  %vm540_vm0 = vmmov 0   ;;  %vm41_vm1 = vcmask 261120   ;;  %vm438_vm2 = vcmask 254976   ;;  %s675_s2 = inlined_call_operand.vmem [shape: f32[32,32], index: 2, kind: input, shape index: {}]   ;;  %s676_s0 = inlined_call_operand.vmem [shape: f32[2,32], index: 0, kind: input, shape index: {}]   ;;  %s677_s4 = inlined_call_operand.vmem [shape: f32[32,32], index: 4, kind: input, shape index: {}]   ;;  %s678_s1 = inlined_call_operand.vmem [shape: f32[2,32], index: 1, kind: input, shape index: {}]   ;;  %s679_s3 = inlined_call_operand.vmem [shape: f32[1,32], index: 3, kind: input, shape index: {}]   ;;  %s680_s5 = inlined_call_operand.vmem [shape: f32[1,32], index: 5, kind: input, shape index: {}]   ;;  %s681_s6 = inlined_call_operand.vmem [shape: f32[32,32], index: 6, kind: input, shape index: {}]   ;;  %s682_s7 = inlined_call_operand.vmem [shape: f32[1,32], index: 7, kind: input, shape index: {}]   ;;  %s683_s8 = inlined_call_operand.vmem [shape: f32[2,32], index: 8, kind: output, shape index: {}]  }
   0x1   :  { %478 = vmatprep.subr.mxu0 %v539_v0  ;;  %v33_v1 = vld [vmem:[%s675_s2 + $0x18] sm:$0xff]  ;;  %v32_v2 = vld [vmem:[%s675_s2 + $0x10] sm:$0xff]  ;;  %486 = vmatprep.mubr.msk.f32.mxu0 %vm540_vm0, %v539_v0  ;;  %v31_v3 = vld [vmem:[%s675_s2 + $0x8] sm:$0xff] }
   0x2   :  { %479 = vmatpush3.msra.mxu0 %v33_v1  ;;  %489 = vmatprep.subr.mxu1 %v539_v0  ;;  %v30_v4 = vld [vmem:[%s675_s2] sm:$0xff]  ;;  %v192_v6 = vld [vmem:[%s677_s4 + $0x18] sm:$0xff]  ;;  %v191_v7 = vld [vmem:[%s677_s4 + $0x10] sm:$0xff] }
   0x3   :  { %480 = vmatprep.subr.mxu0 %v539_v0  ;;  %490 = vmatpush3.msra.mxu1 %v33_v1  ;;  %v29_v5 = vld [vmem:[%s676_s0] sm:$0x3]  ;;  %v190_v8 = vld [vmem:[%s677_s4 + $0x8] sm:$0xff]  ;;  %v357_v19 = vld [vmem:[%s681_s6 + $0x18] sm:$0xff] }
   0x4   :  { %481 = vmatpush3.msra.mxu0 %v32_v2  ;;  %491 = vmatprep.subr.mxu1 %v539_v0  ;;  %v189_v9 = vld [vmem:[%s677_s4] sm:$0xff]  ;;  %v356_v20 = vld [vmem:[%s681_s6 + $0x10] sm:$0xff]  ;;  %v355_v21 = vld [vmem:[%s681_s6 + $0x8] sm:$0xff] }
   0x5   :  { %482 = vmatprep.subr.mxu0 %v539_v0  ;;  %492 = vmatpush3.msra.mxu1 %v32_v2  ;;  %v188_v10 = vld [vmem:[%s678_s1] sm:$0x3] }
   0x6   :  { %483 = vmatpush3.msra.mxu0 %v31_v3  ;;  %493 = vmatprep.subr.mxu1 %v539_v0  ;;  %v444_v11 = vld [vmem:[%s679_s3] ss:$0 sm:$0xff] }
   0x7   :  { %484 = vmatprep.subr.mxu0 %v539_v0  ;;  %494 = vmatpush3.msra.mxu1 %v31_v3  ;;  %v447_v15 = vld [vmem:[%s680_s5] ss:$0 sm:$0xff] }
   0x8   :  { %485 = vmatpush3.msra.mxu0 %v30_v4  ;;  %495 = vmatprep.subr.mxu1 %v539_v0  ;;  %v354_v22 = vld [vmem:[%s681_s6] sm:$0xff] }
   0x9   :  { %487 = vmatmul.mubr.msk.f32.vlgmr.msra.gmra.mxu0 %vm41_vm1, %v29_v5  ;;  %500 = vmatprep.subr.mxu0 %v539_v0  ;;  %v451_v35 = vld [vmem:[%s682_s7] ss:$0 sm:$0xff] }
   0xa   :  { %501 = vmatpush3.msra.mxu0 %v192_v6  ;;  %508 = vmatprep.mubr.msk.f32.mxu0 %vm540_vm0, %v539_v0 }
   0xb   :  { %502 = vmatprep.subr.mxu0 %v539_v0  ;;  %496 = vmatpush3.msra.mxu1 %v30_v4 }
   0xc   :  { %503 = vmatpush3.msra.mxu0 %v191_v7  ;;  %497 = vmatprep.mubr.msk.f32.mxu1 %vm540_vm0, %v539_v0 }
   0xd   :  { %504 = vmatprep.subr.mxu0 %v539_v0  ;;  %511 = vmatprep.subr.mxu1 %v539_v0 }
   0xe   :  { %505 = vmatpush3.msra.mxu0 %v190_v8 }
   0xf   :  { %506 = vmatprep.subr.mxu0 %v539_v0 }
  0x10   :  { %507 = vmatpush3.msra.mxu0 %v189_v9 }
  0x11   :  { %509 = vmatmul.mubr.msk.f32.vlgmr.msra.gmra.mxu0 %vm41_vm1, %v188_v10  ;;  %522 = vmatprep.subr.mxu0 %v539_v0 }
  0x12   :  { %530 = vmatprep.mubr.msk.f32.mxu0 %vm540_vm0, %v539_v0  ;;  %523 = vmatpush3.msra.mxu0 %v357_v19 }
  0x13   :  { %524 = vmatprep.subr.mxu0 %v539_v0 }
  0x14   :  { %525 = vmatpush3.msra.mxu0 %v356_v20 }
  0x15   :  { %526 = vmatprep.subr.mxu0 %v539_v0 }
  0x16   :  { %527 = vmatpush3.msra.mxu0 %v355_v21 }
  0x17   :  { %528 = vmatprep.subr.mxu0 %v539_v0 }
  0x18   :  { %529 = vmatpush3.msra.mxu0 %v354_v22 }
  0xc9   :  { %v111_v12 = vpop.f32.mrf.mxu0 }
  0xca   :  { %v112_v13 = vadd.f32 %v444_v11, %v111_v12 }
  0xcb   :  { %v488_v14 = vpop.f32.mrf.mxu0 }
  0xcc   :  { %498 = vmatmul.mubr.msk.f32.vlgmr.msra.gmra.mxu1 %vm41_vm1, %v112_v13 }
  0xcd   :  { %512 = vmatpush3.msra.mxu1 %v192_v6  ;;  %519 = vmatprep.mubr.msk.f32.mxu1 %vm540_vm0, %v539_v0 }
  0xce   :  { %513 = vmatprep.subr.mxu1 %v539_v0 }
  0xcf   :  { %514 = vmatpush3.msra.mxu1 %v191_v7 }
  0xd0   :  { %515 = vmatprep.subr.mxu1 %v539_v0 }
  0xd1   :  { %v269_v16 = vpop.f32.mrf.mxu0  ;;  %516 = vmatpush3.msra.mxu1 %v190_v8 }
  0xd2   :  { %v270_v17 = vadd.f32 %v447_v15, %v269_v16  ;;  %517 = vmatprep.subr.mxu1 %v539_v0 }
  0xd3   :  { %v510_v18 = vpop.f32.mrf.mxu0  ;;  %518 = vmatpush3.msra.mxu1 %v189_v9 }
  0xd4   :  { %520 = vmatmul.mubr.msk.f32.vlgmr.msra.gmra.mxu1 %vm41_vm1, %v270_v17 }
 0x18c   :  { %v184_v23 = vpop.f32.mrf.mxu1 }
 0x18d   :  { %v185_v26 = vadd.f32 %v444_v11, %v184_v23 }
 0x18e   :  { %v499_v24 = vpop.f32.mrf.mxu1 }
 0x194   :  { %v342_v25 = vpop.f32.mrf.mxu1 }
 0x195   :  { %v343_v27 = vadd.f32 %v447_v15, %v342_v25 }
 0x196   :  { %v521_v28 = vpop.f32.mrf.mxu1 }
 0x197   :  { %v346_v29 = vadd.f32 %v343_v27, %v185_v26 }
 0x199   :  { %v450_v30 = vmul.f32 -0.5, %v346_v29 }
 0x19b   :  { %v349_v31 = vmul.f32 1.442695, %v450_v30 }
 0x19d   :  { %535 = vpow2.f32 %v349_v31 }
 0x1aa   :  { %v536_v32 = vpop.eup %535 }
 0x1ab   :  { %v351_v33 = vadd.f32 1.0, %v536_v32 }
 0x1ad   :  { %537 = vrcp.f32 %v351_v33 }
 0x1ba   :  { %v538_v34 = vpop.eup %537 }
 0x1bb   :  { %531 = vmatmul.mubr.msk.f32.vlgmr.msra.gmra.mxu0 %vm41_vm1, %v538_v34 }
 0x27b   :  { %v434_v36 = vpop.f32.mrf.mxu0 }
 0x27c   :  { %v435_v37 = vadd.f32 %v451_v35, %v434_v36 }
 0x27d   :  { %v532_v38 = vpop.f32.mrf.mxu0 }
 0x27e   :  { %439 = vst.msk [vmem:[%s683_s8] sm:$0x3] %vm438_vm2, %v435_v37 }

</bundles_post_ra>
